<compile_context>
chip_gen: v6e
topology: v6e:2x2x1
jax: 0.10.0
libtpu: 0.0.40
codegen_flags: <defaults>
</compile_context>

<pallas_src>
import functools

import jax
import jax.numpy as jnp
from jax import lax
from jax.experimental import pallas as pl
from jax.experimental.pallas import tpu as pltpu


def lstm_forward_kernel(
    state_ref, dist_ref,
    encw1_ref, encb1_ref, encw2_ref, encb2_ref,      # fused encoders
    whh0_ref, wih0_ref, b0_ref,                      # layer 0 (b0 = bih0 + bhh0)
    wih1_ref, whh1_ref, b1_ref,                      # layer 1 (b1 = bih1 + bhh1)
    decw_ref, decb_ref,                              # decoder Linear -> ReLU
    headw_ref, headb_ref,                            # fused dual heads [fin_w | fin2_w]
    heads_ref,                                       # single lane-dense output (T*n, 2*n_action)
    gih0_scr, out_scr,                               # (T*n, 4H), (T*n, H)
    *, lstm_hidden, unroll,
):
    H = lstm_hidden
    LH = 2 * H                                       # lstm_layer = 2
    n = state_ref.shape[0]
    TN = dist_ref.shape[0]                           # T * n (pre-flattened)
    T = TN // n
    f32 = jnp.float32

    # ---------------- fused encoders (2 matmuls instead of 4) ----------------
    state = state_ref[...]                                           # (n, n_state)
    e = jnp.maximum(
        jnp.dot(state, encw1_ref[...], preferred_element_type=f32) + encb1_ref[...], 0.0)
    hc = jnp.maximum(
        jnp.dot(e, encw2_ref[...], preferred_element_type=f32) + encb2_ref[...], 0.0)
    # columns: [h0 layer0 | h0 layer1 | c0 layer0 | c0 layer1]
    h0 = hc[:, 0 * H:1 * H]
    h1 = hc[:, 1 * H:2 * H]
    c0 = hc[:, LH + 0 * H:LH + 1 * H]
    c1 = hc[:, LH + 1 * H:LH + 2 * H]

    # ---------------- layer-0 input projection, off the serial path ----------------
    # dist_ref is already (T*n, n_dist): no in-kernel reshape, contiguous 2-D store.
    gih0_scr[...] = (jnp.dot(dist_ref[...], wih0_ref[...], preferred_element_type=f32)
                     + b0_ref[...])

    whh0 = whh0_ref[...]
    wih1 = wih1_ref[...]
    whh1 = whh1_ref[...]

    # ---------------- hoisted loop-invariant broadcasts (JAX does not CSE these) ----
    b1b = jnp.broadcast_to(b1_ref[...], (n, 4 * H))                  # (n, 4H), once
    col = lax.broadcasted_iota(jnp.int32, (n, 4 * H), 1)
    is_g = jnp.logical_and(col >= 2 * H, col < 3 * H)
    # tanh(x*scale)*scale + offset == sigmoid(x) on i/f/o lanes, tanh(x) on g lanes.
    g_scale = jnp.where(is_g, jnp.float32(1.0), jnp.float32(0.5))    # (n, 4H)
    g_off = jnp.where(is_g, jnp.float32(0.0), jnp.float32(0.5))      # (n, 4H)

    def cell(g, c_prev):
        # one full-width EUP tanh for all 4 gates, then cheap VPU slices/fmas
        act = jnp.tanh(g * g_scale) * g_scale + g_off
        i = act[:, 0 * H:1 * H]
        f = act[:, 1 * H:2 * H]
        gg = act[:, 2 * H:3 * H]
        o = act[:, 3 * H:4 * H]
        c_new = f * c_prev + i * gg
        h_new = o * jnp.tanh(c_new)
        return h_new, c_new

    # ---------------- sequential LSTM recurrence over time ----------------
    def step(t, carry):
        h0, c0, h1, c1 = carry
        row = pl.ds(t * n, n)

        # layer-1 recurrent half: depends only on previous-step h1 -> issues early,
        # overlapping with layer-0's matmul (no per-step concat).
        g1_rec = jnp.dot(h1, whh1, preferred_element_type=f32) + b1b

        # layer 0: only the h-dependent matmul remains on the serial chain
        g0 = gih0_scr[row, :] + jnp.dot(h0, whh0, preferred_element_type=f32)
        h0n, c0n = cell(g0, c0)

        # layer 1: input half once h0n is ready
        g1 = g1_rec + jnp.dot(h0n, wih1, preferred_element_type=f32)
        h1n, c1n = cell(g1, c1)

        out_scr[row, :] = h1n
        return (h0n, c0n, h1n, c1n)

    lax.fori_loop(0, T, step, (h0, c0, h1, c1), unroll=unroll)

    # ---------------- batched decoder + fused dual heads, single bulk store ----------
    d = jnp.maximum(
        jnp.dot(out_scr[...], decw_ref[...], preferred_element_type=f32) + decb_ref[...], 0.0)
    heads_ref[...] = jnp.dot(d, headw_ref[...], preferred_element_type=f32) + headb_ref[...]


def lstm_pallas(state, disturbance, p, *, lstm_hidden, lstm_layer, n_action):
    assert lstm_layer == 2, "kernel is specialized for lstm_layer=2 (module default)"
    T, n, n_dist = disturbance.shape
    H = lstm_hidden
    LH = H * lstm_layer
    hidden_dec = p["dec_w"].shape[1]
    n_state = state.shape[1]

    # ---------------- host-side layout-only packing (no extra FLOPs) ----------------
    enc_w1 = jnp.concatenate([p["e1w1"], p["e2w1"]], axis=1)               # (n_state, 8)
    enc_b1 = jnp.concatenate([p["e1b1"], p["e2b1"]], axis=1)               # (1, 8)
    k1, k2 = p["e1w2"].shape[0], p["e2w2"].shape[0]
    enc_w2 = jnp.block([[p["e1w2"], jnp.zeros((k1, LH), jnp.float32)],
                        [jnp.zeros((k2, LH), jnp.float32), p["e2w2"]]])    # (8, 2*LH)
    enc_b2 = jnp.concatenate([p["e1b2"], p["e2b2"]], axis=1)               # (1, 2*LH)
    b0 = p["bih0"] + p["bhh0"]                                             # (1, 4H)
    b1 = p["bih1"] + p["bhh1"]                                             # (1, 4H)
    head_w = jnp.concatenate([p["fin_w"], p["fin2_w"]], axis=1)            # (hidden_dec, 2*n_action)
    head_b = jnp.concatenate([p["fin_b"], p["fin2_b"]], axis=1)            # (1, 2*n_action)

    dist_flat = disturbance.reshape(T * n, n_dist)                         # flatten outside kernel

    args = (state, dist_flat,
            enc_w1, enc_b1, enc_w2, enc_b2,
            p["whh0"], p["wih0"], b0,
            p["wih1"], p["whh1"], b1,
            p["dec_w"], p["dec_b"],
            head_w, head_b)

    # advisory cost estimate for XLA's scheduler (HBM-visible traffic only)
    flops = int(2 * (n * n_state * enc_w1.shape[1]
                     + n * enc_w1.shape[1] * enc_w2.shape[1]
                     + T * n * n_dist * 4 * H          # precomputed layer-0 ih
                     + T * n * H * 4 * H               # layer-0 hh
                     + 2 * T * n * H * 4 * H           # layer-1 ih + hh
                     + T * n * H * hidden_dec          # decoder
                     + T * n * hidden_dec * 2 * n_action))
    transcendentals = int(T * n * 2 * 5 * H)            # 1 fused gate tanh (4H) + tanh(c) per layer
    bytes_accessed = int(sum(int(a.size) * a.dtype.itemsize for a in args)
                         + T * n * 2 * n_action * 4)

    unroll = True if T <= 16 else 8                      # bounded unroll for long sequences

    vmem = pl.BlockSpec(memory_space=pltpu.MemorySpace.VMEM)
    kernel = functools.partial(lstm_forward_kernel, lstm_hidden=H, unroll=unroll)
    heads = pl.pallas_call(
        kernel,
        out_shape=jax.ShapeDtypeStruct((T * n, 2 * n_action), jnp.float32),
        in_specs=[vmem] * len(args),
        out_specs=vmem,
        scratch_shapes=[pltpu.VMEM((T * n, 4 * H), jnp.float32),   # precomputed layer-0 gates
                        pltpu.VMEM((T * n, H), jnp.float32)],      # per-step layer-1 hidden
        cost_estimate=pl.CostEstimate(flops=flops,
                                      transcendentals=transcendentals,
                                      bytes_accessed=bytes_accessed),
    )(*args)

    # split + reshape outside the kernel (lane-dense single store inside)
    mu = heads[:, :n_action].reshape(T, n, n_action)
    sigma_sq = heads[:, n_action:2 * n_action].reshape(T, n, n_action)
    return mu, sigma_sq


def lstm_reference(state, disturbance, p, *, lstm_hidden, lstm_layer):
    """Pure-JAX reference mirroring the PyTorch forward pass (unpacked weights)."""
    H = lstm_hidden
    e1 = jax.nn.relu(state @ p["e1w1"] + p["e1b1"])
    h0f = jax.nn.relu(e1 @ p["e1w2"] + p["e1b2"])
    e2 = jax.nn.relu(state @ p["e2w1"] + p["e2b1"])
    c0f = jax.nn.relu(e2 @ p["e2w2"] + p["e2b2"])
    h = [h0f[:, l * H:(l + 1) * H] for l in range(lstm_layer)]
    c = [c0f[:, l * H:(l + 1) * H] for l in range(lstm_layer)]
    outs = []
    for t in range(disturbance.shape[0]):
        x = disturbance[t]
        for l in range(lstm_layer):
            g = x @ p[f"wih{l}"] + p[f"bih{l}"] + h[l] @ p[f"whh{l}"] + p[f"bhh{l}"]
            i = jax.nn.sigmoid(g[:, :H])
            f = jax.nn.sigmoid(g[:, H:2 * H])
            gg = jnp.tanh(g[:, 2 * H:3 * H])
            o = jax.nn.sigmoid(g[:, 3 * H:4 * H])
            c[l] = f * c[l] + i * gg
            h[l] = o * jnp.tanh(c[l])
            x = h[l]
        outs.append(x)
    out = jnp.stack(outs)                                      # (T, n, H)
    d = jax.nn.relu(out @ p["dec_w"] + p["dec_b"])
    mu = d @ p["fin_w"] + p["fin_b"]
    sigma_sq = d @ p["fin2_w"] + p["fin2_b"]
    return mu, sigma_sq


if __name__ == "__main__":
    # Module hyper-parameters (defaults of the PyTorch module, bi=False)
    n_state, n_action, n_dist = 4, 3, 5
    lstm_hidden, lstm_layer = 8, 2
    hidden_dec = 4                     # hiddens=[4]
    n, T = 2, 8                        # batch, sequence length

    key = jax.random.PRNGKey(0)
    ks = iter(jax.random.split(key, 32))

    def init(shape, scale=0.3):
        return scale * jax.random.normal(next(ks), shape, dtype=jnp.float32)

    LH = lstm_hidden * lstm_layer      # n_direction=1
    params = {
        # encoder1: Linear(n_state,4) -> ReLU -> Linear(4, LH) -> ReLU
        "e1w1": init((n_state, 4)), "e1b1": init((1, 4)),
        "e1w2": init((4, LH)),      "e1b2": init((1, LH)),
        # encoder2
        "e2w1": init((n_state, 4)), "e2b1": init((1, 4)),
        "e2w2": init((4, LH)),      "e2b2": init((1, LH)),
        # LSTM layer 0 (input n_dist) and layer 1 (input lstm_hidden), gate order i,f,g,o
        "wih0": init((n_dist, 4 * lstm_hidden)), "whh0": init((lstm_hidden, 4 * lstm_hidden)),
        "bih0": init((1, 4 * lstm_hidden)),      "bhh0": init((1, 4 * lstm_hidden)),
        "wih1": init((lstm_hidden, 4 * lstm_hidden)), "whh1": init((lstm_hidden, 4 * lstm_hidden)),
        "bih1": init((1, 4 * lstm_hidden)),           "bhh1": init((1, 4 * lstm_hidden)),
        # decoder: Linear(lstm_hidden, 4) -> ReLU
        "dec_w": init((lstm_hidden, hidden_dec)), "dec_b": init((1, hidden_dec)),
        # heads
        "fin_w": init((hidden_dec, n_action)),  "fin_b": init((1, n_action)),
        "fin2_w": init((hidden_dec, n_action)), "fin2_b": init((1, n_action)),
    }

    state = jax.random.normal(next(ks), (n, n_state), dtype=jnp.float32)
    disturbance = jax.random.normal(next(ks), (T, n, n_dist), dtype=jnp.float32)

    mu, sigma_sq = lstm_pallas(state, disturbance, params,
                               lstm_hidden=lstm_hidden, lstm_layer=lstm_layer,
                               n_action=n_action)
    jax.block_until_ready((mu, sigma_sq))

    mu_ref, sig_ref = lstm_reference(state, disturbance, params,
                                     lstm_hidden=lstm_hidden, lstm_layer=lstm_layer)
    assert mu.shape == (T, n, n_action) and sigma_sq.shape == (T, n, n_action)
    assert jnp.allclose(mu, mu_ref, atol=1e-4, rtol=1e-4)
    assert jnp.allclose(sigma_sq, sig_ref, atol=1e-4, rtol=1e-4)

    print("KERNEL_OK")
</pallas_src>

<mosaic_0001>
module attributes {stable_mosaic.version = 11 : i64} {
  func.func @lstm_forward_kernel(%arg0: memref<2x4xf32, #tpu.memory_space<vmem>>, %arg1: memref<16x5xf32, #tpu.memory_space<vmem>>, %arg2: memref<4x8xf32, #tpu.memory_space<vmem>>, %arg3: memref<1x8xf32, #tpu.memory_space<vmem>>, %arg4: memref<8x32xf32, #tpu.memory_space<vmem>>, %arg5: memref<1x32xf32, #tpu.memory_space<vmem>>, %arg6: memref<8x32xf32, #tpu.memory_space<vmem>>, %arg7: memref<5x32xf32, #tpu.memory_space<vmem>>, %arg8: memref<1x32xf32, #tpu.memory_space<vmem>>, %arg9: memref<8x32xf32, #tpu.memory_space<vmem>>, %arg10: memref<8x32xf32, #tpu.memory_space<vmem>>, %arg11: memref<1x32xf32, #tpu.memory_space<vmem>>, %arg12: memref<8x4xf32, #tpu.memory_space<vmem>>, %arg13: memref<1x4xf32, #tpu.memory_space<vmem>>, %arg14: memref<4x6xf32, #tpu.memory_space<vmem>>, %arg15: memref<1x6xf32, #tpu.memory_space<vmem>>, %arg16: memref<16x6xf32, #tpu.memory_space<vmem>>, %arg17: memref<16x32xf32, #tpu.memory_space<vmem>>, %arg18: memref<16x8xf32, #tpu.memory_space<vmem>>) attributes {dimension_semantics = [], scalar_prefetch = 0 : i64, scratch_operands = 2 : i64, tpu.core_type = #tpu.core_type<tc>} {
    %c0 = arith.constant 0 : index
    %c0_0 = arith.constant 0 : index
    %0 = vector.load %arg0[%c0, %c0_0] : memref<2x4xf32, #tpu.memory_space<vmem>>, vector<2x4xf32>
    %c0_1 = arith.constant 0 : index
    %c0_2 = arith.constant 0 : index
    %1 = vector.load %arg2[%c0_1, %c0_2] : memref<4x8xf32, #tpu.memory_space<vmem>>, vector<4x8xf32>
    %cst = arith.constant dense<0.000000e+00> : vector<2x8xf32>
    %2 = tpu.matmul %0, %1, %cst {dimension_numbers = #tpu.dot_dimension_numbers<[1], [0], [0], [1], [0, 0, 1, 1], [], []>} : vector<2x4xf32>, vector<4x8xf32>, vector<2x8xf32> -> vector<2x8xf32>
    %c0_3 = arith.constant 0 : index
    %c0_4 = arith.constant 0 : index
    %3 = vector.load %arg3[%c0_3, %c0_4] : memref<1x8xf32, #tpu.memory_space<vmem>>, vector<1x8xf32>
    %4 = vector.broadcast %3 : vector<1x8xf32> to vector<2x8xf32>
    %5 = arith.addf %2, %4 : vector<2x8xf32>
    %cst_5 = arith.constant 0.000000e+00 : f32
    %6 = vector.broadcast %cst_5 : f32 to vector<2x8xf32>
    %7 = arith.maximumf %5, %6 : vector<2x8xf32>
    %c0_6 = arith.constant 0 : index
    %c0_7 = arith.constant 0 : index
    %8 = vector.load %arg4[%c0_6, %c0_7] : memref<8x32xf32, #tpu.memory_space<vmem>>, vector<8x32xf32>
    %cst_8 = arith.constant dense<0.000000e+00> : vector<2x32xf32>
    %9 = tpu.matmul %7, %8, %cst_8 {dimension_numbers = #tpu.dot_dimension_numbers<[1], [0], [0], [1], [0, 0, 1, 1], [], []>} : vector<2x8xf32>, vector<8x32xf32>, vector<2x32xf32> -> vector<2x32xf32>
    %c0_9 = arith.constant 0 : index
    %c0_10 = arith.constant 0 : index
    %10 = vector.load %arg5[%c0_9, %c0_10] : memref<1x32xf32, #tpu.memory_space<vmem>>, vector<1x32xf32>
    %11 = vector.broadcast %10 : vector<1x32xf32> to vector<2x32xf32>
    %12 = arith.addf %9, %11 : vector<2x32xf32>
    %cst_11 = arith.constant 0.000000e+00 : f32
    %13 = vector.broadcast %cst_11 : f32 to vector<2x32xf32>
    %14 = arith.maximumf %12, %13 : vector<2x32xf32>
    %15 = vector.extract_strided_slice %14 {offsets = [0, 0], sizes = [2, 8], strides = [1, 1]} : vector<2x32xf32> to vector<2x8xf32>
    %16 = vector.extract_strided_slice %14 {offsets = [0, 8], sizes = [2, 8], strides = [1, 1]} : vector<2x32xf32> to vector<2x8xf32>
    %17 = vector.extract_strided_slice %14 {offsets = [0, 16], sizes = [2, 8], strides = [1, 1]} : vector<2x32xf32> to vector<2x8xf32>
    %18 = vector.extract_strided_slice %14 {offsets = [0, 24], sizes = [2, 8], strides = [1, 1]} : vector<2x32xf32> to vector<2x8xf32>
    %c0_12 = arith.constant 0 : index
    %c0_13 = arith.constant 0 : index
    %19 = vector.load %arg1[%c0_12, %c0_13] : memref<16x5xf32, #tpu.memory_space<vmem>>, vector<16x5xf32>
    %c0_14 = arith.constant 0 : index
    %c0_15 = arith.constant 0 : index
    %20 = vector.load %arg7[%c0_14, %c0_15] : memref<5x32xf32, #tpu.memory_space<vmem>>, vector<5x32xf32>
    %cst_16 = arith.constant dense<0.000000e+00> : vector<16x32xf32>
    %21 = tpu.matmul %19, %20, %cst_16 {dimension_numbers = #tpu.dot_dimension_numbers<[1], [0], [0], [1], [0, 0, 1, 1], [], []>} : vector<16x5xf32>, vector<5x32xf32>, vector<16x32xf32> -> vector<16x32xf32>
    %c0_17 = arith.constant 0 : index
    %c0_18 = arith.constant 0 : index
    %22 = vector.load %arg8[%c0_17, %c0_18] : memref<1x32xf32, #tpu.memory_space<vmem>>, vector<1x32xf32>
    %23 = vector.broadcast %22 : vector<1x32xf32> to vector<16x32xf32>
    %24 = arith.addf %21, %23 : vector<16x32xf32>
    %c0_19 = arith.constant 0 : index
    %c0_20 = arith.constant 0 : index
    %25 = vector.load %arg17[%c0_19, %c0_20] : memref<16x32xf32, #tpu.memory_space<vmem>>, vector<16x32xf32>
    tpu.vector_store %arg17[%c0_19, %c0_20], %24 {strides = array<i32>} : memref<16x32xf32, #tpu.memory_space<vmem>>, vector<16x32xf32>,
    %c0_21 = arith.constant 0 : index
    %c0_22 = arith.constant 0 : index
    %26 = vector.load %arg6[%c0_21, %c0_22] : memref<8x32xf32, #tpu.memory_space<vmem>>, vector<8x32xf32>
    %c0_23 = arith.constant 0 : index
    %c0_24 = arith.constant 0 : index
    %27 = vector.load %arg9[%c0_23, %c0_24] : memref<8x32xf32, #tpu.memory_space<vmem>>, vector<8x32xf32>
    %c0_25 = arith.constant 0 : index
    %c0_26 = arith.constant 0 : index
    %28 = vector.load %arg10[%c0_25, %c0_26] : memref<8x32xf32, #tpu.memory_space<vmem>>, vector<8x32xf32>
    %c0_27 = arith.constant 0 : index
    %c0_28 = arith.constant 0 : index
    %29 = vector.load %arg11[%c0_27, %c0_28] : memref<1x32xf32, #tpu.memory_space<vmem>>, vector<1x32xf32>
    %30 = vector.shape_cast %29 : vector<1x32xf32> to vector<1x32xf32>
    %31 = vector.broadcast %30 : vector<1x32xf32> to vector<2x32xf32>
    %32 = tpu.iota {dimensions = array<i32: 1>} : vector<2x32xi32>
    %c16_i32 = arith.constant 16 : i32
    %33 = vector.broadcast %c16_i32 : i32 to vector<2x32xi32>
    %34 = arith.cmpi sge, %32, %33 : vector<2x32xi32>
    %c24_i32 = arith.constant 24 : i32
    %35 = vector.broadcast %c24_i32 : i32 to vector<2x32xi32>
    %36 = arith.cmpi slt, %32, %35 : vector<2x32xi32>
    %37 = arith.andi %34, %36 : vector<2x32xi1>
    %cst_29 = arith.constant 1.000000e+00 : f32
    %cst_30 = arith.constant 5.000000e-01 : f32
    %38 = vector.broadcast %cst_29 : f32 to vector<2x32xf32>
    %39 = vector.broadcast %cst_30 : f32 to vector<2x32xf32>
    %40 = arith.select %37, %38, %39 : vector<2x32xi1>, vector<2x32xf32>
    %cst_31 = arith.constant 0.000000e+00 : f32
    %cst_32 = arith.constant 5.000000e-01 : f32
    %41 = vector.broadcast %cst_31 : f32 to vector<2x32xf32>
    %42 = vector.broadcast %cst_32 : f32 to vector<2x32xf32>
    %43 = arith.select %37, %41, %42 : vector<2x32xi1>, vector<2x32xf32>
    %c0_i32 = arith.constant 0 : i32
    %c2_i32 = arith.constant 2 : i32
    %44 = arith.muli %c0_i32, %c2_i32 : i32
    %cst_33 = arith.constant dense<0.000000e+00> : vector<2x32xf32>
    %45 = tpu.matmul %16, %28, %cst_33 {dimension_numbers = #tpu.dot_dimension_numbers<[1], [0], [0], [1], [0, 0, 1, 1], [], []>} : vector<2x8xf32>, vector<8x32xf32>, vector<2x32xf32> -> vector<2x32xf32>
    %46 = arith.addf %45, %31 : vector<2x32xf32>
    %47 = arith.index_cast %44 : i32 to index
    %c0_34 = arith.constant 0 : index
    %48 = vector.load %arg17[%47, %c0_34] : memref<16x32xf32, #tpu.memory_space<vmem>>, vector<2x32xf32>
    %cst_35 = arith.constant dense<0.000000e+00> : vector<2x32xf32>
    %49 = tpu.matmul %15, %26, %cst_35 {dimension_numbers = #tpu.dot_dimension_numbers<[1], [0], [0], [1], [0, 0, 1, 1], [], []>} : vector<2x8xf32>, vector<8x32xf32>, vector<2x32xf32> -> vector<2x32xf32>
    %50 = arith.addf %48, %49 : vector<2x32xf32>
    %51 = arith.mulf %50, %40 : vector<2x32xf32>
    %52 = math.tanh %51 : vector<2x32xf32>
    %53 = arith.mulf %52, %40 : vector<2x32xf32>
    %54 = arith.addf %53, %43 : vector<2x32xf32>
    %55 = vector.extract_strided_slice %54 {offsets = [0, 0], sizes = [2, 8], strides = [1, 1]} : vector<2x32xf32> to vector<2x8xf32>
    %56 = vector.extract_strided_slice %54 {offsets = [0, 8], sizes = [2, 8], strides = [1, 1]} : vector<2x32xf32> to vector<2x8xf32>
    %57 = vector.extract_strided_slice %54 {offsets = [0, 16], sizes = [2, 8], strides = [1, 1]} : vector<2x32xf32> to vector<2x8xf32>
    %58 = vector.extract_strided_slice %54 {offsets = [0, 24], sizes = [2, 8], strides = [1, 1]} : vector<2x32xf32> to vector<2x8xf32>
    %59 = arith.mulf %56, %17 : vector<2x8xf32>
    %60 = arith.mulf %55, %57 : vector<2x8xf32>
    %61 = arith.addf %59, %60 : vector<2x8xf32>
    %62 = math.tanh %61 : vector<2x8xf32>
    %63 = arith.mulf %58, %62 : vector<2x8xf32>
    %cst_36 = arith.constant dense<0.000000e+00> : vector<2x32xf32>
    %64 = tpu.matmul %63, %27, %cst_36 {dimension_numbers = #tpu.dot_dimension_numbers<[1], [0], [0], [1], [0, 0, 1, 1], [], []>} : vector<2x8xf32>, vector<8x32xf32>, vector<2x32xf32> -> vector<2x32xf32>
    %65 = arith.addf %46, %64 : vector<2x32xf32>
    %66 = arith.mulf %65, %40 : vector<2x32xf32>
    %67 = math.tanh %66 : vector<2x32xf32>
    %68 = arith.mulf %67, %40 : vector<2x32xf32>
    %69 = arith.addf %68, %43 : vector<2x32xf32>
    %70 = vector.extract_strided_slice %69 {offsets = [0, 0], sizes = [2, 8], strides = [1, 1]} : vector<2x32xf32> to vector<2x8xf32>
    %71 = vector.extract_strided_slice %69 {offsets = [0, 8], sizes = [2, 8], strides = [1, 1]} : vector<2x32xf32> to vector<2x8xf32>
    %72 = vector.extract_strided_slice %69 {offsets = [0, 16], sizes = [2, 8], strides = [1, 1]} : vector<2x32xf32> to vector<2x8xf32>
    %73 = vector.extract_strided_slice %69 {offsets = [0, 24], sizes = [2, 8], strides = [1, 1]} : vector<2x32xf32> to vector<2x8xf32>
    %74 = arith.mulf %71, %18 : vector<2x8xf32>
    %75 = arith.mulf %70, %72 : vector<2x8xf32>
    %76 = arith.addf %74, %75 : vector<2x8xf32>
    %77 = math.tanh %76 : vector<2x8xf32>
    %78 = arith.mulf %73, %77 : vector<2x8xf32>
    %79 = arith.index_cast %44 : i32 to index
    %c0_37 = arith.constant 0 : index
    %80 = vector.load %arg18[%79, %c0_37] : memref<16x8xf32, #tpu.memory_space<vmem>>, vector<2x8xf32>
    tpu.vector_store %arg18[%79, %c0_37], %78 {strides = array<i32>} : memref<16x8xf32, #tpu.memory_space<vmem>>, vector<2x8xf32>,
    %c1_i32 = arith.constant 1 : i32
    %c2_i32_38 = arith.constant 2 : i32
    %81 = arith.muli %c1_i32, %c2_i32_38 : i32
    %cst_39 = arith.constant dense<0.000000e+00> : vector<2x32xf32>
    %82 = tpu.matmul %78, %28, %cst_39 {dimension_numbers = #tpu.dot_dimension_numbers<[1], [0], [0], [1], [0, 0, 1, 1], [], []>} : vector<2x8xf32>, vector<8x32xf32>, vector<2x32xf32> -> vector<2x32xf32>
    %83 = arith.addf %82, %31 : vector<2x32xf32>
    %84 = arith.index_cast %81 : i32 to index
    %c0_40 = arith.constant 0 : index
    %85 = vector.load %arg17[%84, %c0_40] : memref<16x32xf32, #tpu.memory_space<vmem>>, vector<2x32xf32>
    %cst_41 = arith.constant dense<0.000000e+00> : vector<2x32xf32>
    %86 = tpu.matmul %63, %26, %cst_41 {dimension_numbers = #tpu.dot_dimension_numbers<[1], [0], [0], [1], [0, 0, 1, 1], [], []>} : vector<2x8xf32>, vector<8x32xf32>, vector<2x32xf32> -> vector<2x32xf32>
    %87 = arith.addf %85, %86 : vector<2x32xf32>
    %88 = arith.mulf %87, %40 : vector<2x32xf32>
    %89 = math.tanh %88 : vector<2x32xf32>
    %90 = arith.mulf %89, %40 : vector<2x32xf32>
    %91 = arith.addf %90, %43 : vector<2x32xf32>
    %92 = vector.extract_strided_slice %91 {offsets = [0, 0], sizes = [2, 8], strides = [1, 1]} : vector<2x32xf32> to vector<2x8xf32>
    %93 = vector.extract_strided_slice %91 {offsets = [0, 8], sizes = [2, 8], strides = [1, 1]} : vector<2x32xf32> to vector<2x8xf32>
    %94 = vector.extract_strided_slice %91 {offsets = [0, 16], sizes = [2, 8], strides = [1, 1]} : vector<2x32xf32> to vector<2x8xf32>
    %95 = vector.extract_strided_slice %91 {offsets = [0, 24], sizes = [2, 8], strides = [1, 1]} : vector<2x32xf32> to vector<2x8xf32>
    %96 = arith.mulf %93, %61 : vector<2x8xf32>
    %97 = arith.mulf %92, %94 : vector<2x8xf32>
    %98 = arith.addf %96, %97 : vector<2x8xf32>
    %99 = math.tanh %98 : vector<2x8xf32>
    %100 = arith.mulf %95, %99 : vector<2x8xf32>
    %cst_42 = arith.constant dense<0.000000e+00> : vector<2x32xf32>
    %101 = tpu.matmul %100, %27, %cst_42 {dimension_numbers = #tpu.dot_dimension_numbers<[1], [0], [0], [1], [0, 0, 1, 1], [], []>} : vector<2x8xf32>, vector<8x32xf32>, vector<2x32xf32> -> vector<2x32xf32>
    %102 = arith.addf %83, %101 : vector<2x32xf32>
    %103 = arith.mulf %102, %40 : vector<2x32xf32>
    %104 = math.tanh %103 : vector<2x32xf32>
    %105 = arith.mulf %104, %40 : vector<2x32xf32>
    %106 = arith.addf %105, %43 : vector<2x32xf32>
    %107 = vector.extract_strided_slice %106 {offsets = [0, 0], sizes = [2, 8], strides = [1, 1]} : vector<2x32xf32> to vector<2x8xf32>
    %108 = vector.extract_strided_slice %106 {offsets = [0, 8], sizes = [2, 8], strides = [1, 1]} : vector<2x32xf32> to vector<2x8xf32>
    %109 = vector.extract_strided_slice %106 {offsets = [0, 16], sizes = [2, 8], strides = [1, 1]} : vector<2x32xf32> to vector<2x8xf32>
    %110 = vector.extract_strided_slice %106 {offsets = [0, 24], sizes = [2, 8], strides = [1, 1]} : vector<2x32xf32> to vector<2x8xf32>
    %111 = arith.mulf %108, %76 : vector<2x8xf32>
    %112 = arith.mulf %107, %109 : vector<2x8xf32>
    %113 = arith.addf %111, %112 : vector<2x8xf32>
    %114 = math.tanh %113 : vector<2x8xf32>
    %115 = arith.mulf %110, %114 : vector<2x8xf32>
    %116 = arith.index_cast %81 : i32 to index
    %c0_43 = arith.constant 0 : index
    %117 = vector.load %arg18[%116, %c0_43] : memref<16x8xf32, #tpu.memory_space<vmem>>, vector<2x8xf32>
    tpu.vector_store %arg18[%116, %c0_43], %115 {strides = array<i32>} : memref<16x8xf32, #tpu.memory_space<vmem>>, vector<2x8xf32>,
    %c2_i32_44 = arith.constant 2 : i32
    %c2_i32_45 = arith.constant 2 : i32
    %118 = arith.muli %c2_i32_44, %c2_i32_45 : i32
    %cst_46 = arith.constant dense<0.000000e+00> : vector<2x32xf32>
    %119 = tpu.matmul %115, %28, %cst_46 {dimension_numbers = #tpu.dot_dimension_numbers<[1], [0], [0], [1], [0, 0, 1, 1], [], []>} : vector<2x8xf32>, vector<8x32xf32>, vector<2x32xf32> -> vector<2x32xf32>
    %120 = arith.addf %119, %31 : vector<2x32xf32>
    %121 = arith.index_cast %118 : i32 to index
    %c0_47 = arith.constant 0 : index
    %122 = vector.load %arg17[%121, %c0_47] : memref<16x32xf32, #tpu.memory_space<vmem>>, vector<2x32xf32>
    %cst_48 = arith.constant dense<0.000000e+00> : vector<2x32xf32>
    %123 = tpu.matmul %100, %26, %cst_48 {dimension_numbers = #tpu.dot_dimension_numbers<[1], [0], [0], [1], [0, 0, 1, 1], [], []>} : vector<2x8xf32>, vector<8x32xf32>, vector<2x32xf32> -> vector<2x32xf32>
    %124 = arith.addf %122, %123 : vector<2x32xf32>
    %125 = arith.mulf %124, %40 : vector<2x32xf32>
    %126 = math.tanh %125 : vector<2x32xf32>
    %127 = arith.mulf %126, %40 : vector<2x32xf32>
    %128 = arith.addf %127, %43 : vector<2x32xf32>
    %129 = vector.extract_strided_slice %128 {offsets = [0, 0], sizes = [2, 8], strides = [1, 1]} : vector<2x32xf32> to vector<2x8xf32>
    %130 = vector.extract_strided_slice %128 {offsets = [0, 8], sizes = [2, 8], strides = [1, 1]} : vector<2x32xf32> to vector<2x8xf32>
    %131 = vector.extract_strided_slice %128 {offsets = [0, 16], sizes = [2, 8], strides = [1, 1]} : vector<2x32xf32> to vector<2x8xf32>
    %132 = vector.extract_strided_slice %128 {offsets = [0, 24], sizes = [2, 8], strides = [1, 1]} : vector<2x32xf32> to vector<2x8xf32>
    %133 = arith.mulf %130, %98 : vector<2x8xf32>
    %134 = arith.mulf %129, %131 : vector<2x8xf32>
    %135 = arith.addf %133, %134 : vector<2x8xf32>
    %136 = math.tanh %135 : vector<2x8xf32>
    %137 = arith.mulf %132, %136 : vector<2x8xf32>
    %cst_49 = arith.constant dense<0.000000e+00> : vector<2x32xf32>
    %138 = tpu.matmul %137, %27, %cst_49 {dimension_numbers = #tpu.dot_dimension_numbers<[1], [0], [0], [1], [0, 0, 1, 1], [], []>} : vector<2x8xf32>, vector<8x32xf32>, vector<2x32xf32> -> vector<2x32xf32>
    %139 = arith.addf %120, %138 : vector<2x32xf32>
    %140 = arith.mulf %139, %40 : vector<2x32xf32>
    %141 = math.tanh %140 : vector<2x32xf32>
    %142 = arith.mulf %141, %40 : vector<2x32xf32>
    %143 = arith.addf %142, %43 : vector<2x32xf32>
    %144 = vector.extract_strided_slice %143 {offsets = [0, 0], sizes = [2, 8], strides = [1, 1]} : vector<2x32xf32> to vector<2x8xf32>
    %145 = vector.extract_strided_slice %143 {offsets = [0, 8], sizes = [2, 8], strides = [1, 1]} : vector<2x32xf32> to vector<2x8xf32>
    %146 = vector.extract_strided_slice %143 {offsets = [0, 16], sizes = [2, 8], strides = [1, 1]} : vector<2x32xf32> to vector<2x8xf32>
    %147 = vector.extract_strided_slice %143 {offsets = [0, 24], sizes = [2, 8], strides = [1, 1]} : vector<2x32xf32> to vector<2x8xf32>
    %148 = arith.mulf %145, %113 : vector<2x8xf32>
    %149 = arith.mulf %144, %146 : vector<2x8xf32>
    %150 = arith.addf %148, %149 : vector<2x8xf32>
    %151 = math.tanh %150 : vector<2x8xf32>
    %152 = arith.mulf %147, %151 : vector<2x8xf32>
    %153 = arith.index_cast %118 : i32 to index
    %c0_50 = arith.constant 0 : index
    %154 = vector.load %arg18[%153, %c0_50] : memref<16x8xf32, #tpu.memory_space<vmem>>, vector<2x8xf32>
    tpu.vector_store %arg18[%153, %c0_50], %152 {strides = array<i32>} : memref<16x8xf32, #tpu.memory_space<vmem>>, vector<2x8xf32>,
    %c3_i32 = arith.constant 3 : i32
    %c2_i32_51 = arith.constant 2 : i32
    %155 = arith.muli %c3_i32, %c2_i32_51 : i32
    %cst_52 = arith.constant dense<0.000000e+00> : vector<2x32xf32>
    %156 = tpu.matmul %152, %28, %cst_52 {dimension_numbers = #tpu.dot_dimension_numbers<[1], [0], [0], [1], [0, 0, 1, 1], [], []>} : vector<2x8xf32>, vector<8x32xf32>, vector<2x32xf32> -> vector<2x32xf32>
    %157 = arith.addf %156, %31 : vector<2x32xf32>
    %158 = arith.index_cast %155 : i32 to index
    %c0_53 = arith.constant 0 : index
    %159 = vector.load %arg17[%158, %c0_53] : memref<16x32xf32, #tpu.memory_space<vmem>>, vector<2x32xf32>
    %cst_54 = arith.constant dense<0.000000e+00> : vector<2x32xf32>
    %160 = tpu.matmul %137, %26, %cst_54 {dimension_numbers = #tpu.dot_dimension_numbers<[1], [0], [0], [1], [0, 0, 1, 1], [], []>} : vector<2x8xf32>, vector<8x32xf32>, vector<2x32xf32> -> vector<2x32xf32>
    %161 = arith.addf %159, %160 : vector<2x32xf32>
    %162 = arith.mulf %161, %40 : vector<2x32xf32>
    %163 = math.tanh %162 : vector<2x32xf32>
    %164 = arith.mulf %163, %40 : vector<2x32xf32>
    %165 = arith.addf %164, %43 : vector<2x32xf32>
    %166 = vector.extract_strided_slice %165 {offsets = [0, 0], sizes = [2, 8], strides = [1, 1]} : vector<2x32xf32> to vector<2x8xf32>
    %167 = vector.extract_strided_slice %165 {offsets = [0, 8], sizes = [2, 8], strides = [1, 1]} : vector<2x32xf32> to vector<2x8xf32>
    %168 = vector.extract_strided_slice %165 {offsets = [0, 16], sizes = [2, 8], strides = [1, 1]} : vector<2x32xf32> to vector<2x8xf32>
    %169 = vector.extract_strided_slice %165 {offsets = [0, 24], sizes = [2, 8], strides = [1, 1]} : vector<2x32xf32> to vector<2x8xf32>
    %170 = arith.mulf %167, %135 : vector<2x8xf32>
    %171 = arith.mulf %166, %168 : vector<2x8xf32>
    %172 = arith.addf %170, %171 : vector<2x8xf32>
    %173 = math.tanh %172 : vector<2x8xf32>
    %174 = arith.mulf %169, %173 : vector<2x8xf32>
    %cst_55 = arith.constant dense<0.000000e+00> : vector<2x32xf32>
    %175 = tpu.matmul %174, %27, %cst_55 {dimension_numbers = #tpu.dot_dimension_numbers<[1], [0], [0], [1], [0, 0, 1, 1], [], []>} : vector<2x8xf32>, vector<8x32xf32>, vector<2x32xf32> -> vector<2x32xf32>
    %176 = arith.addf %157, %175 : vector<2x32xf32>
    %177 = arith.mulf %176, %40 : vector<2x32xf32>
    %178 = math.tanh %177 : vector<2x32xf32>
    %179 = arith.mulf %178, %40 : vector<2x32xf32>
    %180 = arith.addf %179, %43 : vector<2x32xf32>
    %181 = vector.extract_strided_slice %180 {offsets = [0, 0], sizes = [2, 8], strides = [1, 1]} : vector<2x32xf32> to vector<2x8xf32>
    %182 = vector.extract_strided_slice %180 {offsets = [0, 8], sizes = [2, 8], strides = [1, 1]} : vector<2x32xf32> to vector<2x8xf32>
    %183 = vector.extract_strided_slice %180 {offsets = [0, 16], sizes = [2, 8], strides = [1, 1]} : vector<2x32xf32> to vector<2x8xf32>
    %184 = vector.extract_strided_slice %180 {offsets = [0, 24], sizes = [2, 8], strides = [1, 1]} : vector<2x32xf32> to vector<2x8xf32>
    %185 = arith.mulf %182, %150 : vector<2x8xf32>
    %186 = arith.mulf %181, %183 : vector<2x8xf32>
    %187 = arith.addf %185, %186 : vector<2x8xf32>
    %188 = math.tanh %187 : vector<2x8xf32>
    %189 = arith.mulf %184, %188 : vector<2x8xf32>
    %190 = arith.index_cast %155 : i32 to index
    %c0_56 = arith.constant 0 : index
    %191 = vector.load %arg18[%190, %c0_56] : memref<16x8xf32, #tpu.memory_space<vmem>>, vector<2x8xf32>
    tpu.vector_store %arg18[%190, %c0_56], %189 {strides = array<i32>} : memref<16x8xf32, #tpu.memory_space<vmem>>, vector<2x8xf32>,
    %c4_i32 = arith.constant 4 : i32
    %c2_i32_57 = arith.constant 2 : i32
    %192 = arith.muli %c4_i32, %c2_i32_57 : i32
    %cst_58 = arith.constant dense<0.000000e+00> : vector<2x32xf32>
    %193 = tpu.matmul %189, %28, %cst_58 {dimension_numbers = #tpu.dot_dimension_numbers<[1], [0], [0], [1], [0, 0, 1, 1], [], []>} : vector<2x8xf32>, vector<8x32xf32>, vector<2x32xf32> -> vector<2x32xf32>
    %194 = arith.addf %193, %31 : vector<2x32xf32>
    %195 = arith.index_cast %192 : i32 to index
    %c0_59 = arith.constant 0 : index
    %196 = vector.load %arg17[%195, %c0_59] : memref<16x32xf32, #tpu.memory_space<vmem>>, vector<2x32xf32>
    %cst_60 = arith.constant dense<0.000000e+00> : vector<2x32xf32>
    %197 = tpu.matmul %174, %26, %cst_60 {dimension_numbers = #tpu.dot_dimension_numbers<[1], [0], [0], [1], [0, 0, 1, 1], [], []>} : vector<2x8xf32>, vector<8x32xf32>, vector<2x32xf32> -> vector<2x32xf32>
    %198 = arith.addf %196, %197 : vector<2x32xf32>
    %199 = arith.mulf %198, %40 : vector<2x32xf32>
    %200 = math.tanh %199 : vector<2x32xf32>
    %201 = arith.mulf %200, %40 : vector<2x32xf32>
    %202 = arith.addf %201, %43 : vector<2x32xf32>
    %203 = vector.extract_strided_slice %202 {offsets = [0, 0], sizes = [2, 8], strides = [1, 1]} : vector<2x32xf32> to vector<2x8xf32>
    %204 = vector.extract_strided_slice %202 {offsets = [0, 8], sizes = [2, 8], strides = [1, 1]} : vector<2x32xf32> to vector<2x8xf32>
    %205 = vector.extract_strided_slice %202 {offsets = [0, 16], sizes = [2, 8], strides = [1, 1]} : vector<2x32xf32> to vector<2x8xf32>
    %206 = vector.extract_strided_slice %202 {offsets = [0, 24], sizes = [2, 8], strides = [1, 1]} : vector<2x32xf32> to vector<2x8xf32>
    %207 = arith.mulf %204, %172 : vector<2x8xf32>
    %208 = arith.mulf %203, %205 : vector<2x8xf32>
    %209 = arith.addf %207, %208 : vector<2x8xf32>
    %210 = math.tanh %209 : vector<2x8xf32>
    %211 = arith.mulf %206, %210 : vector<2x8xf32>
    %cst_61 = arith.constant dense<0.000000e+00> : vector<2x32xf32>
    %212 = tpu.matmul %211, %27, %cst_61 {dimension_numbers = #tpu.dot_dimension_numbers<[1], [0], [0], [1], [0, 0, 1, 1], [], []>} : vector<2x8xf32>, vector<8x32xf32>, vector<2x32xf32> -> vector<2x32xf32>
    %213 = arith.addf %194, %212 : vector<2x32xf32>
    %214 = arith.mulf %213, %40 : vector<2x32xf32>
    %215 = math.tanh %214 : vector<2x32xf32>
    %216 = arith.mulf %215, %40 : vector<2x32xf32>
    %217 = arith.addf %216, %43 : vector<2x32xf32>
    %218 = vector.extract_strided_slice %217 {offsets = [0, 0], sizes = [2, 8], strides = [1, 1]} : vector<2x32xf32> to vector<2x8xf32>
    %219 = vector.extract_strided_slice %217 {offsets = [0, 8], sizes = [2, 8], strides = [1, 1]} : vector<2x32xf32> to vector<2x8xf32>
    %220 = vector.extract_strided_slice %217 {offsets = [0, 16], sizes = [2, 8], strides = [1, 1]} : vector<2x32xf32> to vector<2x8xf32>
    %221 = vector.extract_strided_slice %217 {offsets = [0, 24], sizes = [2, 8], strides = [1, 1]} : vector<2x32xf32> to vector<2x8xf32>
    %222 = arith.mulf %219, %187 : vector<2x8xf32>
    %223 = arith.mulf %218, %220 : vector<2x8xf32>
    %224 = arith.addf %222, %223 : vector<2x8xf32>
    %225 = math.tanh %224 : vector<2x8xf32>
    %226 = arith.mulf %221, %225 : vector<2x8xf32>
    %227 = arith.index_cast %192 : i32 to index
    %c0_62 = arith.constant 0 : index
    %228 = vector.load %arg18[%227, %c0_62] : memref<16x8xf32, #tpu.memory_space<vmem>>, vector<2x8xf32>
    tpu.vector_store %arg18[%227, %c0_62], %226 {strides = array<i32>} : memref<16x8xf32, #tpu.memory_space<vmem>>, vector<2x8xf32>,
    %c5_i32 = arith.constant 5 : i32
    %c2_i32_63 = arith.constant 2 : i32
    %229 = arith.muli %c5_i32, %c2_i32_63 : i32
    %cst_64 = arith.constant dense<0.000000e+00> : vector<2x32xf32>
    %230 = tpu.matmul %226, %28, %cst_64 {dimension_numbers = #tpu.dot_dimension_numbers<[1], [0], [0], [1], [0, 0, 1, 1], [], []>} : vector<2x8xf32>, vector<8x32xf32>, vector<2x32xf32> -> vector<2x32xf32>
    %231 = arith.addf %230, %31 : vector<2x32xf32>
    %232 = arith.index_cast %229 : i32 to index
    %c0_65 = arith.constant 0 : index
    %233 = vector.load %arg17[%232, %c0_65] : memref<16x32xf32, #tpu.memory_space<vmem>>, vector<2x32xf32>
    %cst_66 = arith.constant dense<0.000000e+00> : vector<2x32xf32>
    %234 = tpu.matmul %211, %26, %cst_66 {dimension_numbers = #tpu.dot_dimension_numbers<[1], [0], [0], [1], [0, 0, 1, 1], [], []>} : vector<2x8xf32>, vector<8x32xf32>, vector<2x32xf32> -> vector<2x32xf32>
    %235 = arith.addf %233, %234 : vector<2x32xf32>
    %236 = arith.mulf %235, %40 : vector<2x32xf32>
    %237 = math.tanh %236 : vector<2x32xf32>
    %238 = arith.mulf %237, %40 : vector<2x32xf32>
    %239 = arith.addf %238, %43 : vector<2x32xf32>
    %240 = vector.extract_strided_slice %239 {offsets = [0, 0], sizes = [2, 8], strides = [1, 1]} : vector<2x32xf32> to vector<2x8xf32>
    %241 = vector.extract_strided_slice %239 {offsets = [0, 8], sizes = [2, 8], strides = [1, 1]} : vector<2x32xf32> to vector<2x8xf32>
    %242 = vector.extract_strided_slice %239 {offsets = [0, 16], sizes = [2, 8], strides = [1, 1]} : vector<2x32xf32> to vector<2x8xf32>
    %243 = vector.extract_strided_slice %239 {offsets = [0, 24], sizes = [2, 8], strides = [1, 1]} : vector<2x32xf32> to vector<2x8xf32>
    %244 = arith.mulf %241, %209 : vector<2x8xf32>
    %245 = arith.mulf %240, %242 : vector<2x8xf32>
    %246 = arith.addf %244, %245 : vector<2x8xf32>
    %247 = math.tanh %246 : vector<2x8xf32>
    %248 = arith.mulf %243, %247 : vector<2x8xf32>
    %cst_67 = arith.constant dense<0.000000e+00> : vector<2x32xf32>
    %249 = tpu.matmul %248, %27, %cst_67 {dimension_numbers = #tpu.dot_dimension_numbers<[1], [0], [0], [1], [0, 0, 1, 1], [], []>} : vector<2x8xf32>, vector<8x32xf32>, vector<2x32xf32> -> vector<2x32xf32>
    %250 = arith.addf %231, %249 : vector<2x32xf32>
    %251 = arith.mulf %250, %40 : vector<2x32xf32>
    %252 = math.tanh %251 : vector<2x32xf32>
    %253 = arith.mulf %252, %40 : vector<2x32xf32>
    %254 = arith.addf %253, %43 : vector<2x32xf32>
    %255 = vector.extract_strided_slice %254 {offsets = [0, 0], sizes = [2, 8], strides = [1, 1]} : vector<2x32xf32> to vector<2x8xf32>
    %256 = vector.extract_strided_slice %254 {offsets = [0, 8], sizes = [2, 8], strides = [1, 1]} : vector<2x32xf32> to vector<2x8xf32>
    %257 = vector.extract_strided_slice %254 {offsets = [0, 16], sizes = [2, 8], strides = [1, 1]} : vector<2x32xf32> to vector<2x8xf32>
    %258 = vector.extract_strided_slice %254 {offsets = [0, 24], sizes = [2, 8], strides = [1, 1]} : vector<2x32xf32> to vector<2x8xf32>
    %259 = arith.mulf %256, %224 : vector<2x8xf32>
    %260 = arith.mulf %255, %257 : vector<2x8xf32>
    %261 = arith.addf %259, %260 : vector<2x8xf32>
    %262 = math.tanh %261 : vector<2x8xf32>
    %263 = arith.mulf %258, %262 : vector<2x8xf32>
    %264 = arith.index_cast %229 : i32 to index
    %c0_68 = arith.constant 0 : index
    %265 = vector.load %arg18[%264, %c0_68] : memref<16x8xf32, #tpu.memory_space<vmem>>, vector<2x8xf32>
    tpu.vector_store %arg18[%264, %c0_68], %263 {strides = array<i32>} : memref<16x8xf32, #tpu.memory_space<vmem>>, vector<2x8xf32>,
    %c6_i32 = arith.constant 6 : i32
    %c2_i32_69 = arith.constant 2 : i32
    %266 = arith.muli %c6_i32, %c2_i32_69 : i32
    %cst_70 = arith.constant dense<0.000000e+00> : vector<2x32xf32>
    %267 = tpu.matmul %263, %28, %cst_70 {dimension_numbers = #tpu.dot_dimension_numbers<[1], [0], [0], [1], [0, 0, 1, 1], [], []>} : vector<2x8xf32>, vector<8x32xf32>, vector<2x32xf32> -> vector<2x32xf32>
    %268 = arith.addf %267, %31 : vector<2x32xf32>
    %269 = arith.index_cast %266 : i32 to index
    %c0_71 = arith.constant 0 : index
    %270 = vector.load %arg17[%269, %c0_71] : memref<16x32xf32, #tpu.memory_space<vmem>>, vector<2x32xf32>
    %cst_72 = arith.constant dense<0.000000e+00> : vector<2x32xf32>
    %271 = tpu.matmul %248, %26, %cst_72 {dimension_numbers = #tpu.dot_dimension_numbers<[1], [0], [0], [1], [0, 0, 1, 1], [], []>} : vector<2x8xf32>, vector<8x32xf32>, vector<2x32xf32> -> vector<2x32xf32>
    %272 = arith.addf %270, %271 : vector<2x32xf32>
    %273 = arith.mulf %272, %40 : vector<2x32xf32>
    %274 = math.tanh %273 : vector<2x32xf32>
    %275 = arith.mulf %274, %40 : vector<2x32xf32>
    %276 = arith.addf %275, %43 : vector<2x32xf32>
    %277 = vector.extract_strided_slice %276 {offsets = [0, 0], sizes = [2, 8], strides = [1, 1]} : vector<2x32xf32> to vector<2x8xf32>
    %278 = vector.extract_strided_slice %276 {offsets = [0, 8], sizes = [2, 8], strides = [1, 1]} : vector<2x32xf32> to vector<2x8xf32>
    %279 = vector.extract_strided_slice %276 {offsets = [0, 16], sizes = [2, 8], strides = [1, 1]} : vector<2x32xf32> to vector<2x8xf32>
    %280 = vector.extract_strided_slice %276 {offsets = [0, 24], sizes = [2, 8], strides = [1, 1]} : vector<2x32xf32> to vector<2x8xf32>
    %281 = arith.mulf %278, %246 : vector<2x8xf32>
    %282 = arith.mulf %277, %279 : vector<2x8xf32>
    %283 = arith.addf %281, %282 : vector<2x8xf32>
    %284 = math.tanh %283 : vector<2x8xf32>
    %285 = arith.mulf %280, %284 : vector<2x8xf32>
    %cst_73 = arith.constant dense<0.000000e+00> : vector<2x32xf32>
    %286 = tpu.matmul %285, %27, %cst_73 {dimension_numbers = #tpu.dot_dimension_numbers<[1], [0], [0], [1], [0, 0, 1, 1], [], []>} : vector<2x8xf32>, vector<8x32xf32>, vector<2x32xf32> -> vector<2x32xf32>
    %287 = arith.addf %268, %286 : vector<2x32xf32>
    %288 = arith.mulf %287, %40 : vector<2x32xf32>
    %289 = math.tanh %288 : vector<2x32xf32>
    %290 = arith.mulf %289, %40 : vector<2x32xf32>
    %291 = arith.addf %290, %43 : vector<2x32xf32>
    %292 = vector.extract_strided_slice %291 {offsets = [0, 0], sizes = [2, 8], strides = [1, 1]} : vector<2x32xf32> to vector<2x8xf32>
    %293 = vector.extract_strided_slice %291 {offsets = [0, 8], sizes = [2, 8], strides = [1, 1]} : vector<2x32xf32> to vector<2x8xf32>
    %294 = vector.extract_strided_slice %291 {offsets = [0, 16], sizes = [2, 8], strides = [1, 1]} : vector<2x32xf32> to vector<2x8xf32>
    %295 = vector.extract_strided_slice %291 {offsets = [0, 24], sizes = [2, 8], strides = [1, 1]} : vector<2x32xf32> to vector<2x8xf32>
    %296 = arith.mulf %293, %261 : vector<2x8xf32>
    %297 = arith.mulf %292, %294 : vector<2x8xf32>
    %298 = arith.addf %296, %297 : vector<2x8xf32>
    %299 = math.tanh %298 : vector<2x8xf32>
    %300 = arith.mulf %295, %299 : vector<2x8xf32>
    %301 = arith.index_cast %266 : i32 to index
    %c0_74 = arith.constant 0 : index
    %302 = vector.load %arg18[%301, %c0_74] : memref<16x8xf32, #tpu.memory_space<vmem>>, vector<2x8xf32>
    tpu.vector_store %arg18[%301, %c0_74], %300 {strides = array<i32>} : memref<16x8xf32, #tpu.memory_space<vmem>>, vector<2x8xf32>,
    %c7_i32 = arith.constant 7 : i32
    %c2_i32_75 = arith.constant 2 : i32
    %303 = arith.muli %c7_i32, %c2_i32_75 : i32
    %cst_76 = arith.constant dense<0.000000e+00> : vector<2x32xf32>
    %304 = tpu.matmul %300, %28, %cst_76 {dimension_numbers = #tpu.dot_dimension_numbers<[1], [0], [0], [1], [0, 0, 1, 1], [], []>} : vector<2x8xf32>, vector<8x32xf32>, vector<2x32xf32> -> vector<2x32xf32>
    %305 = arith.addf %304, %31 : vector<2x32xf32>
    %306 = arith.index_cast %303 : i32 to index
    %c0_77 = arith.constant 0 : index
    %307 = vector.load %arg17[%306, %c0_77] : memref<16x32xf32, #tpu.memory_space<vmem>>, vector<2x32xf32>
    %cst_78 = arith.constant dense<0.000000e+00> : vector<2x32xf32>
    %308 = tpu.matmul %285, %26, %cst_78 {dimension_numbers = #tpu.dot_dimension_numbers<[1], [0], [0], [1], [0, 0, 1, 1], [], []>} : vector<2x8xf32>, vector<8x32xf32>, vector<2x32xf32> -> vector<2x32xf32>
    %309 = arith.addf %307, %308 : vector<2x32xf32>
    %310 = arith.mulf %309, %40 : vector<2x32xf32>
    %311 = math.tanh %310 : vector<2x32xf32>
    %312 = arith.mulf %311, %40 : vector<2x32xf32>
    %313 = arith.addf %312, %43 : vector<2x32xf32>
    %314 = vector.extract_strided_slice %313 {offsets = [0, 0], sizes = [2, 8], strides = [1, 1]} : vector<2x32xf32> to vector<2x8xf32>
    %315 = vector.extract_strided_slice %313 {offsets = [0, 8], sizes = [2, 8], strides = [1, 1]} : vector<2x32xf32> to vector<2x8xf32>
    %316 = vector.extract_strided_slice %313 {offsets = [0, 16], sizes = [2, 8], strides = [1, 1]} : vector<2x32xf32> to vector<2x8xf32>
    %317 = vector.extract_strided_slice %313 {offsets = [0, 24], sizes = [2, 8], strides = [1, 1]} : vector<2x32xf32> to vector<2x8xf32>
    %318 = arith.mulf %315, %283 : vector<2x8xf32>
    %319 = arith.mulf %314, %316 : vector<2x8xf32>
    %320 = arith.addf %318, %319 : vector<2x8xf32>
    %321 = math.tanh %320 : vector<2x8xf32>
    %322 = arith.mulf %317, %321 : vector<2x8xf32>
    %cst_79 = arith.constant dense<0.000000e+00> : vector<2x32xf32>
    %323 = tpu.matmul %322, %27, %cst_79 {dimension_numbers = #tpu.dot_dimension_numbers<[1], [0], [0], [1], [0, 0, 1, 1], [], []>} : vector<2x8xf32>, vector<8x32xf32>, vector<2x32xf32> -> vector<2x32xf32>
    %324 = arith.addf %305, %323 : vector<2x32xf32>
    %325 = arith.mulf %324, %40 : vector<2x32xf32>
    %326 = math.tanh %325 : vector<2x32xf32>
    %327 = arith.mulf %326, %40 : vector<2x32xf32>
    %328 = arith.addf %327, %43 : vector<2x32xf32>
    %329 = vector.extract_strided_slice %328 {offsets = [0, 0], sizes = [2, 8], strides = [1, 1]} : vector<2x32xf32> to vector<2x8xf32>
    %330 = vector.extract_strided_slice %328 {offsets = [0, 8], sizes = [2, 8], strides = [1, 1]} : vector<2x32xf32> to vector<2x8xf32>
    %331 = vector.extract_strided_slice %328 {offsets = [0, 16], sizes = [2, 8], strides = [1, 1]} : vector<2x32xf32> to vector<2x8xf32>
    %332 = vector.extract_strided_slice %328 {offsets = [0, 24], sizes = [2, 8], strides = [1, 1]} : vector<2x32xf32> to vector<2x8xf32>
    %333 = arith.mulf %330, %298 : vector<2x8xf32>
    %334 = arith.mulf %329, %331 : vector<2x8xf32>
    %335 = arith.addf %333, %334 : vector<2x8xf32>
    %336 = math.tanh %335 : vector<2x8xf32>
    %337 = arith.mulf %332, %336 : vector<2x8xf32>
    %338 = arith.index_cast %303 : i32 to index
    %c0_80 = arith.constant 0 : index
    %339 = vector.load %arg18[%338, %c0_80] : memref<16x8xf32, #tpu.memory_space<vmem>>, vector<2x8xf32>
    tpu.vector_store %arg18[%338, %c0_80], %337 {strides = array<i32>} : memref<16x8xf32, #tpu.memory_space<vmem>>, vector<2x8xf32>,
    %c8_i32 = arith.constant 8 : i32
    %c0_81 = arith.constant 0 : index
    %c0_82 = arith.constant 0 : index
    %340 = vector.load %arg18[%c0_81, %c0_82] : memref<16x8xf32, #tpu.memory_space<vmem>>, vector<16x8xf32>
    %c0_83 = arith.constant 0 : index
    %c0_84 = arith.constant 0 : index
    %341 = vector.load %arg12[%c0_83, %c0_84] : memref<8x4xf32, #tpu.memory_space<vmem>>, vector<8x4xf32>
    %cst_85 = arith.constant dense<0.000000e+00> : vector<16x4xf32>
    %342 = tpu.matmul %340, %341, %cst_85 {dimension_numbers = #tpu.dot_dimension_numbers<[1], [0], [0], [1], [0, 0, 1, 1], [], []>} : vector<16x8xf32>, vector<8x4xf32>, vector<16x4xf32> -> vector<16x4xf32>
    %c0_86 = arith.constant 0 : index
    %c0_87 = arith.constant 0 : index
    %343 = vector.load %arg13[%c0_86, %c0_87] : memref<1x4xf32, #tpu.memory_space<vmem>>, vector<1x4xf32>
    %344 = vector.broadcast %343 : vector<1x4xf32> to vector<16x4xf32>
    %345 = arith.addf %342, %344 : vector<16x4xf32>
    %cst_88 = arith.constant 0.000000e+00 : f32
    %346 = vector.broadcast %cst_88 : f32 to vector<16x4xf32>
    %347 = arith.maximumf %345, %346 : vector<16x4xf32>
    %c0_89 = arith.constant 0 : index
    %c0_90 = arith.constant 0 : index
    %348 = vector.load %arg14[%c0_89, %c0_90] : memref<4x6xf32, #tpu.memory_space<vmem>>, vector<4x6xf32>
    %cst_91 = arith.constant dense<0.000000e+00> : vector<16x6xf32>
    %349 = tpu.matmul %347, %348, %cst_91 {dimension_numbers = #tpu.dot_dimension_numbers<[1], [0], [0], [1], [0, 0, 1, 1], [], []>} : vector<16x4xf32>, vector<4x6xf32>, vector<16x6xf32> -> vector<16x6xf32>
    %c0_92 = arith.constant 0 : index
    %c0_93 = arith.constant 0 : index
    %350 = vector.load %arg15[%c0_92, %c0_93] : memref<1x6xf32, #tpu.memory_space<vmem>>, vector<1x6xf32>
    %351 = vector.broadcast %350 : vector<1x6xf32> to vector<16x6xf32>
    %352 = arith.addf %349, %351 : vector<16x6xf32>
    %c0_94 = arith.constant 0 : index
    %c0_95 = arith.constant 0 : index
    %353 = vector.load %arg16[%c0_94, %c0_95] : memref<16x6xf32, #tpu.memory_space<vmem>>, vector<16x6xf32>
    tpu.vector_store %arg16[%c0_94, %c0_95], %352 {strides = array<i32>} : memref<16x6xf32, #tpu.memory_space<vmem>>, vector<16x6xf32>,
    return
  }
}

</mosaic_0001>

<bundles_post_ra>
// kernel: tpu_custom_call.1
= control target key start
LH: loop header
LB: loop body
LE: loop exit
PB: predicated region body
PF: predicated region fallthrough
CT: control target
= control target key end

     0   :  { %s3642_s0 = inlined_call_operand.hbm [shape: f32[2,4], index: 0, kind: input, shape index: {}]   ;;  %s3643_s1 = inlined_call_operand.vmem [shape: f32[16,5], index: 1, kind: input, shape index: {}]   ;;  %s3644_s2 = inlined_call_operand.hbm [shape: f32[4,8], index: 2, kind: input, shape index: {}]   ;;  %s3645_s3 = inlined_call_operand.hbm [shape: f32[1,8], index: 3, kind: input, shape index: {}]   ;;  %s3646_s4 = inlined_call_operand.vmem [shape: f32[8,32], index: 4, kind: input, shape index: {}]   ;;  %s3647_s5 = inlined_call_operand.hbm [shape: f32[1,32], index: 5, kind: input, shape index: {}]   ;;  %s3648_s6 = inlined_call_operand.vmem [shape: f32[8,32], index: 6, kind: input, shape index: {}]   ;;  %s3649_s7 = inlined_call_operand.vmem [shape: f32[5,32], index: 7, kind: input, shape index: {}]   ;;  %s3650_s8 = inlined_call_operand.hbm [shape: f32[1,32], index: 8, kind: input, shape index: {}]   ;;  %s3651_s9 = inlined_call_operand.vmem [shape: f32[8,32], index: 9, kind: input, shape index: {}]   ;;  %s3652_s10 = inlined_call_operand.vmem [shape: f32[8,32], index: 10, kind: input, shape index: {}]   ;;  %s3653_s11 = inlined_call_operand.hbm [shape: f32[1,32], index: 11, kind: input, shape index: {}]   ;;  %s3654_s12 = inlined_call_operand.vmem [shape: f32[8,4], index: 12, kind: input, shape index: {}]   ;;  %s3655_s13 = inlined_call_operand.vmem [shape: f32[1,4], index: 13, kind: input, shape index: {}]   ;;  %s3656_s14 = inlined_call_operand.vmem [shape: f32[4,6], index: 14, kind: input, shape index: {}]   ;;  %s3657_s15 = inlined_call_operand.vmem [shape: f32[1,6], index: 15, kind: input, shape index: {}]   ;;  %s3658_s16 = inlined_call_operand.vmem [shape: f32[16,6], index: 16, kind: output, shape index: {}]  }
   0x1   :  { %3659 = sst [smem:[#allocation18_spill]] %s3642_s0 }
   0x2   :  { %21 = vsyncpa [#allocation5], 0 }
   0x3   :  { %22 = vsyncpa [#allocation7], 0 }
   0x4   :  { %23 = vsyncpa [#allocation10], 0 }
   0x5   :  { %24 = vsyncpa [#allocation13], 0  ;;  %s3205_s21 = smov [#allocation6]   ;;  %s3206_s23 = smov [#allocation9]  }
   0x6   :  { %s43_s22 = sshll.u32 %s3205_s21, 4  ;;  %s65_s24 = sshll.u32 %s3206_s23, 4  ;;  %s44_s22 = int_to_ptr.vmem [resolvable:$true] %s43_s22  ;;  %s66_s24 = int_to_ptr.vmem [resolvable:$true] %s65_s24 }
   0x7   :  { %s3085_s25 = scalar_lea.vmem %s44_s22, 64  ;;  %p3090_p1 = scmp.lt.s32.totalorder %s44_s22, %s44_s22 }
   0x8   :  { %p3086_p0 = scmp.ne.s32.totalorder %s44_s22, %s3085_s25  ;;  %p3091_p2 = scmp.lt.s32.totalorder %s3085_s25, %s3085_s25 }
   0xa   :  { %p3092_p3 = por %p3091_p2, %p3090_p1 }
   0xc   :  { %p3093_p4 = pnand %p3092_p3, %p3086_p0 }
   0xe   :  { %3096 = shalt.err (!%p3093_p4)
}
   0xf   :  { %46 = dma.hbm_to_vmem [thread:$0]  %s3644_s2, 64, %s44_s22, [#allocation7]  }
  0x10   :  { %s3105_s28 = scalar_lea.vmem %s66_s24, 16  ;;  %s3109_s29 = scalar_lea.vmem %s66_s24, 32 }
  0x11   :  { %p3106_p5 = scmp.ne.s32.totalorder %s66_s24, %s3105_s28  ;;  %p3110_p6 = scmp.lt.s32.totalorder %s66_s24, %s66_s24 }
  0x12   :  { %p3111_p7 = scmp.lt.s32.totalorder %s3109_s29, %s3105_s28 }
  0x14   :  { %p3112_p8 = por %p3111_p7, %p3110_p6 }
  0x16   :  { %p3113_p9 = pnand %p3112_p8, %p3106_p5 }
  0x18   :  { %3116 = shalt.err (!%p3113_p9)
}
  0x19   :  { %68 = dma.hbm_to_vmem [thread:$0]  %s3647_s5, 16, %s66_s24, [#allocation10]  }
  0x1a   :  { %s3207_s17 = smov [#allocation4]   ;;  %s3208_s19 = smov [#allocation8]  }
  0x1b   :  { %s31_s18 = sshll.u32 %s3207_s17, 4  ;;  %s53_s20 = sshll.u32 %s3208_s19, 4  ;;  %s32_s18 = int_to_ptr.vmem [resolvable:$true] %s31_s18  ;;  %s54_s20 = int_to_ptr.vmem [resolvable:$true] %s53_s20 }
  0x1c   :  { %s3125_s21 = scalar_lea.vmem %s32_s18, 32  ;;  %p3130_p11 = scmp.lt.s32.totalorder %s32_s18, %s32_s18 }
  0x1d   :  { %p3126_p10 = scmp.ne.s32.totalorder %s32_s18, %s3125_s21  ;;  %p3131_p12 = scmp.lt.s32.totalorder %s3125_s21, %s3125_s21 }
  0x1f   :  { %p3132_p13 = por %p3131_p12, %p3130_p11 }
  0x21   :  { %p3133_p0 = pnand %p3132_p13, %p3126_p10 }
  0x23   :  { %3136 = shalt.err (!%p3133_p0)
}
  0x24   :  { %s3660_s23 = sld [smem:[#allocation18_spill]]  ;;  %s3145_s25 = scalar_lea.vmem %s54_s20, 16 }
  0x25   :  { %p3146_p1 = scmp.ne.s32.totalorder %s54_s20, %s3145_s25  ;;  %s3149_s5 = scalar_lea.vmem %s54_s20, 32 }
  0x26   :  { %p3150_p2 = scmp.lt.s32.totalorder %s54_s20, %s54_s20  ;;  %p3151_p3 = scmp.lt.s32.totalorder %s3149_s5, %s3145_s25 }
  0x28   :  { %p3152_p4 = por %p3151_p3, %p3150_p2 }
  0x2a   :  { %34 = dma.hbm_to_vmem [thread:$0]  %s3660_s23, 32, %s32_s18, [#allocation5]  }
  0x2b   :  { %p3153_p5 = pnand %p3152_p4, %p3146_p1 }
  0x2d   :  { %3156 = shalt.err (!%p3153_p5)
}
  0x2e   :  { %56 = dma.hbm_to_vmem [thread:$0]  %s3645_s3, 16, %s54_s20, [#allocation7]  }
  0x2f   :  { %s3209_s27 = smov [#allocation11]   ;;  %s3210_s29 = smov [#allocation12]  }
  0x30   :  { %s79_s28 = sshll.u32 %s3209_s27, 4  ;;  %s93_s30 = sshll.u32 %s3210_s29, 4  ;;  %s80_s28 = int_to_ptr.vmem [resolvable:$true] %s79_s28  ;;  %s94_s30 = int_to_ptr.vmem [resolvable:$true] %s93_s30 }
  0x31   :  { %s3165_s0 = scalar_lea.vmem %s80_s28, 16  ;;  %s3169_s17 = scalar_lea.vmem %s80_s28, 32 }
  0x32   :  { %p3166_p6 = scmp.ne.s32.totalorder %s80_s28, %s3165_s0  ;;  %p3170_p7 = scmp.lt.s32.totalorder %s80_s28, %s80_s28 }
  0x33   :  { %p3171_p8 = scmp.lt.s32.totalorder %s3169_s17, %s3165_s0 }
  0x35   :  { %p3172_p9 = por %p3171_p8, %p3170_p7 }
  0x37   :  { %p3173_p10 = pnand %p3172_p9, %p3166_p6 }
  0x39   :  { %3176 = shalt.err (!%p3173_p10)
}
  0x3a   :  { %82 = dma.hbm_to_vmem [thread:$0]  %s3650_s8, 16, %s80_s28, [#allocation10]  }
  0x3b   :  { %s3185_s21 = scalar_lea.vmem %s94_s30, 16  ;;  %s3189_s3 = scalar_lea.vmem %s94_s30, 32 }
  0x3c   :  { %p3186_p11 = scmp.ne.s32.totalorder %s94_s30, %s3185_s21  ;;  %p3190_p12 = scmp.lt.s32.totalorder %s94_s30, %s94_s30 }
  0x3d   :  { %p3191_p13 = scmp.lt.s32.totalorder %s3189_s3, %s3185_s21 }
  0x3f   :  { %p3192_p0 = por %p3191_p13, %p3190_p12 }
  0x41   :  { %p3193_p1 = pnand %p3192_p0, %p3186_p11 }
  0x43   :  { %3196 = shalt.err (!%p3193_p1)
}
  0x44   :  { %96 = dma.hbm_to_vmem [thread:$0]  %s3653_s11, 16, %s94_s30, [#allocation13]  }
  0x45   :  { %3197 = dma.done.wait [#allocation5], 32  }
  0x46   :  { %3198 = vsyncadd [#allocation5], 4294967264 }
  0x47   :  { %3199 = dma.done.wait [#allocation7], 80  }
  0x48   :  { %3200 = vsyncadd [#allocation7], 4294967216 }
  0x49   :  { %3201 = dma.done.wait [#allocation10], 32  }
  0x4a   :  { %3202 = vsyncadd [#allocation10], 4294967264 }
  0x4b   :  { %3203 = dma.done.wait [#allocation13], 16  }
  0x4c   :  { %3204 = vsyncadd [#allocation13], 4294967280  ;;  %v3211_v0 = vmov 0.0   ;;  %vm3212_vm0 = vmmov 0   ;;  %vm136_vm1 = vcmask 1043456   ;;  %vm132_vm2 = vcmask 31744  }
  0x4d   :  { %2854 = vmatprep.subr.mxu0 %v3211_v0  ;;  %2856 = vmatprep.mubr.msk.f32.mxu0 %vm3212_vm0, %v3211_v0  ;;  %v124_v1 = vld [vmem:[#allocation6] sm:$0xf]  ;;  %v123_v2 = vld [vmem:[#allocation4] sm:$0x3]  ;;  %vm311_vm3 = vcmask 1044480   ;;  %vm304_vm4 = vcmask 39936   ;;  %v403_v23 = vlaneseq }
  0x4e   :  { %2859 = vmatprep.subr.mxu1 %v3211_v0  ;;  %2861 = vmatprep.mubr.msk.f32.mxu1 %vm3212_vm0, %v3211_v0  ;;  %v211_v3 = vld [vmem:[%s3646_s4] sm:$0xff]  ;;  %v295_v6 = vld [vmem:[%s3643_s1 + $0x8] sm:$0xff]  ;;  %vm219_vm5 = vcmask 64512   ;;  %vm390_vm6 = vcmask 261120   ;;  %v3213_v25 = vmov 0.5   ;;  %s3214_s27 = smov 112  }
  0x4f   :  { %2855 = vmatpush3.msk.msra.mxu0 %vm136_vm1, %v124_v1  ;;  %2860 = vmatpush3.msra.mxu1 %v211_v3  ;;  %v296_v4 = vld [vmem:[%s3649_s7] sm:$0x1f]  ;;  %v2752_v7 = vld [vmem:[#allocation8] ss:$0 sm:$0xff]  ;;  %v2757_v14 = vld [vmem:[#allocation11] ss:$0 sm:$0xff] }
  0x50   :  { %2857 = vmatmul.mubr.msk.f32.vlgmr.msra.gmra.mxu0 %vm132_vm2, %v123_v2  ;;  %v294_v5 = vld [vmem:[%s3643_s1] sm:$0xff]  ;;  %2869 = vmatprep.subr.mxu1 %v3211_v0  ;;  %v2755_v18 = vld [vmem:[#allocation9] ss:$0 sm:$0xff]  ;;  %v404_v24 = vand.u32 127, %v403_v23  ;;  %s3216_s28 = smov 8   ;;  %s3217_s0 = smov 16  }
  0x51   :  { %2864 = vmatprep.subr.msk.mxu0 %vm311_vm3, %v296_v4  ;;  %2866 = vmatprep.mubr.msk.f32.mxu0 %vm304_vm4, %v294_v5  ;;  %v3352_v12 = vld [vmem:[%s3648_s6] sm:$0xff]  ;;  %s3218_s17 = smov 104   ;;  %v3403_v50 = vld [vmem:[#allocation12] ss:$0 sm:$0xff]  ;;  %vm685_vm10 = vcmask 58368   ;;  %vm2741_vm11 = vcmask 48128  }
  0x52   :  { %2865 = vmatpush3.msk.msra.mxu0 %vm311_vm3, %v296_v4  ;;  %vm405_vm7 = vcmp.ge.s32.totalorder %v404_v24, 16  ;;  %vm406_vm8 = vcmp.lt.s32.totalorder %v404_v24, 24  ;;  %v3368_v32 = vld [vmem:[%s3652_s10] sm:$0xff]  ;;  %s3215_s10 = smov 120  }
  0x53   :  { %2874 = vmatprep.subr.mxu0 %v3211_v0  ;;  %vm407_vm9 = vmand %vm405_vm7, %vm406_vm8  ;;  %v3387_v43 = vld [vmem:[%s3651_s9] sm:$0xff] }
  0x54   :  { %2867 = vmatmul.mubr.msk.f32.vlgmr.msra.gmra.mxu0 %vm304_vm4, %v295_v6  ;;  %v3362_v26 = vsel %vm407_vm9, 1.0, %v3213_v25  ;;  %v3374_v34 = vsel %vm407_vm9, 0.0, %v3213_v25 }
  0x55   :  { %2876 = vmatprep.mubr.msk.f32.mxu0 %vm3212_vm0, %v3211_v0  ;;  %2875 = vmatpush3.msra.mxu0 %v3352_v12 }
  0x56   :  { %2884 = vmatprep.subr.mxu0 %v3211_v0 }
 0x110   :  { %v206_v8 = vpop.f32.mrf.mxu0 }
 0x111   :  { %v207_v9 = vadd.f32 %v2752_v7, %v206_v8 }
 0x112   :  { %v2858_v10 = vpop.f32.mrf.mxu0 }
 0x113   :  { %v210_v11 = vmax.f32 %v207_v9, 0.0 }
 0x114   :  { %v2868_v13 = vpop.f32.mrf.mxu0 }
 0x115   :  { %2862 = vmatmul.mubr.msk.f32.vlgmr.msra.gmra.mxu1 %vm219_vm5, %v210_v11  ;;  %v387_v15 = vadd.f32 %v2868_v13, %v2757_v14 }
 0x116   :  { %2871 = vmatprep.mubr.msk.f32.mxu1 %vm3212_vm0, %v3211_v0  ;;  %v381_v16 = vpop.f32.mrf.mxu0  ;;  %2870 = vmatpush3.msra.mxu1 %v3368_v32 }
 0x117   :  { %392 = vst.msk [vmem:[#allocation2 + $0x8] sm:$0xff] %vm390_vm6, %v387_v15  ;;  %v382_v17 = vadd.f32 %v2757_v14, %v381_v16  ;;  %2879 = vmatprep.subr.mxu1 %v3211_v0 }
 0x119   :  { %391 = vst.msk [vmem:[#allocation2] sm:$0xff] %vm390_vm6, %v382_v17 }
 0x120   :  { %v485_v27 = vld [vmem:[#allocation2] sm:$0x3]  ;;  %v759_v56 = vld [vmem:[#allocation2 + $0x2] sm:$0x3] }
 0x1d5   :  { %v289_v19 = vpop.f32.mrf.mxu1 }
 0x1d6   :  { %v290_v20 = vadd.f32 %v2755_v18, %v289_v19 }
 0x1d7   :  { %v2863_v21 = vpop.f32.mrf.mxu1 }
 0x1d8   :  { %v3356_v22 = vmax.f32 %v290_v20, 0.0 }
 0x1da   :  { %2877 = vmatmul.mubr.msk.f32.vlgmr.msra.gmra.mxu0 %vm219_vm5, %v3356_v22 }
 0x1db   :  { %2886 = vmatprep.mubr.msk.f32.mxu0 %vm3212_vm0, %v3211_v0  ;;  %2885 = vmatpush3.msra.mxu0 %v3368_v32 }
 0x1dc   :  { %2894 = vmatprep.subr.mxu0 %v3211_v0 }
 0x29a   :  { %v554_v28 = vpop.f32.mrf.mxu0 }
 0x29b   :  { %v558_v29 = vadd.f32 %v554_v28, %v485_v27 }
 0x29c   :  { %v2878_v30 = vpop.f32.mrf.mxu0 }
 0x29d   :  { %v559_v31 = vmul.f32 %v558_v29, %v3362_v26 }
 0x29f   :  { %3013 = vtanh.f32 %v559_v31 }
 0x2ac   :  { %v3014_v33 = vpop.eup %3013 }
 0x2ad   :  { %v561_v35 = vmul.f32 %v3014_v33, %v3362_v26  ;;  %v1026_v33 = vld [vmem:[#allocation2 + $0x4] sm:$0x3] }
 0x2af   :  { %v562_v36 = vadd.f32 %v561_v35, %v3374_v34 }
 0x2b1   :  { %566 = vrot.lane.b32.xlu0 %v562_v36, %s3214_s27 }
 0x2b5   :  { %411 = vrot.lane.b32.xlu0 %v3356_v22, %s3215_s10 }
 0x323   :  { %v567_v37 = vpop.permute.xlu0 %566 }
 0x324   :  { %v569_v38 = vmul.f32 %v567_v37, %v562_v36 }
 0x326   :  { %571 = vrot.lane.b32.xlu1 %v569_v38, %s3216_s28 }
 0x327   :  { %v412_v39 = vpop.permute.xlu0 %411 }
 0x328   :  { %2872 = vmatmul.mubr.msk.f32.vlgmr.msra.gmra.mxu1 %vm219_vm5, %v412_v39  ;;  %v564_v40 = vmul.f32 %v562_v36, %v412_v39 }
 0x329   :  { %2881 = vmatprep.mubr.msk.f32.mxu1 %vm3212_vm0, %v3211_v0  ;;  %2880 = vmatpush3.msra.mxu1 %v3387_v43 }
 0x32a   :  { %2889 = vmatprep.subr.mxu1 %v3211_v0 }
 0x398   :  { %v572_v41 = vpop.permute.xlu1 %571 }
 0x399   :  { %v574_v42 = vadd.f32 %v572_v41, %v564_v40 }
 0x39b   :  { %3015 = vtanh.f32 %v574_v42 }
 0x3a8   :  { %v3016_v44 = vpop.eup %3015 }
 0x3a9   :  { %577 = vrot.lane.b32.xlu1 %v3016_v44, %s3217_s0 }
 0x3e8   :  { %v481_v45 = vpop.f32.mrf.mxu1 }
 0x3e9   :  { %v482_v51 = vadd.f32 %v3403_v50, %v481_v45 }
 0x3ea   :  { %v2873_v46 = vpop.f32.mrf.mxu1 }
 0x41b   :  { %v578_v47 = vpop.permute.xlu1 %577 }
 0x41c   :  { %v580_v48 = vmul.f32 %v578_v47, %v562_v36 }
 0x41e   :  { %582 = vrot.lane.b32.xlu0 %v580_v48, %s3218_s17 }
 0x490   :  { %v583_v49 = vpop.permute.xlu0 %582 }
 0x491   :  { %2882 = vmatmul.mubr.msk.f32.vlgmr.msra.gmra.mxu1 %vm219_vm5, %v583_v49 }
 0x492   :  { %2890 = vmatpush3.msra.mxu1 %v3352_v12  ;;  %2891 = vmatprep.mubr.msk.f32.mxu1 %vm3212_vm0, %v3211_v0 }
 0x493   :  { %2899 = vmatprep.subr.mxu1 %v3211_v0 }
 0x495   :  { %2892 = vmatmul.mubr.msk.f32.vlgmr.msra.gmra.mxu1 %vm219_vm5, %v583_v49 }
 0x496   :  { %2900 = vmatpush3.msra.mxu1 %v3368_v32  ;;  %2901 = vmatprep.mubr.msk.f32.mxu1 %vm3212_vm0, %v3211_v0 }
 0x497   :  { %2909 = vmatprep.subr.mxu1 %v3211_v0 }
 0x551   :  { %v652_v52 = vpop.f32.mrf.mxu1 }
 0x552   :  { %v656_v53 = vadd.f32 %v652_v52, %v482_v51 }
 0x553   :  { %v2883_v54 = vpop.f32.mrf.mxu1 }
 0x554   :  { %v657_v55 = vmul.f32 %v656_v53, %v3362_v26 }
 0x555   :  { %v826_v57 = vpop.f32.mrf.mxu1 }
 0x556   :  { %3017 = vtanh.f32 %v657_v55  ;;  %v830_v58 = vadd.f32 %v826_v57, %v759_v56 }
 0x557   :  { %v2893_v59 = vpop.f32.mrf.mxu1 }
 0x558   :  { %v831_v60 = vmul.f32 %v830_v58, %v3362_v26 }
 0x55a   :  { %3019 = vtanh.f32 %v831_v60 }
 0x563   :  { %v3018_v61 = vpop.eup %3017 }
 0x564   :  { %v659_v62 = vmul.f32 %v3018_v61, %v3362_v26 }
 0x566   :  { %v660_v63 = vadd.f32 %v659_v62, %v3374_v34 }
 0x567   :  { %v3020_v1 = vpop.eup %3019 }
 0x568   :  { %666 = vrot.lane.b32.xlu1 %v660_v63, %s3214_s27  ;;  %v833_v2 = vmul.f32 %v3020_v1, %v3362_v26 }
 0x56a   :  { %v834_v3 = vadd.f32 %v833_v2, %v3374_v34 }
 0x56c   :  { %661 = vrot.lane.b32.xlu1 %v3356_v22, %s3214_s27  ;;  %837 = vrot.lane.b32.xlu0 %v834_v3, %s3214_s27  ;;  %v835_v13 = vmul.f32 %v834_v3, %v574_v42 }
 0x5da   :  { %v667_v4 = vpop.permute.xlu1 %666 }
 0x5db   :  { %v669_v5 = vmul.f32 %v667_v4, %v660_v63 }
 0x5dd   :  { %671 = vrot.lane.b32.xlu0 %v669_v5, %s3216_s28 }
 0x5de   :  { %v838_v6 = vpop.permute.xlu0 %837  ;;  %v662_v8 = vpop.permute.xlu1 %661 }
 0x5df   :  { %v840_v7 = vmul.f32 %v838_v6, %v834_v3  ;;  %v664_v9 = vmul.f32 %v662_v8, %v660_v63 }
 0x5e1   :  { %842 = vrot.lane.b32.xlu1 %v840_v7, %s3216_s28 }
 0x64f   :  { %v672_v10 = vpop.permute.xlu0 %671 }
 0x650   :  { %v674_v11 = vadd.f32 %v672_v10, %v664_v9  ;;  %v1293_v9 = vld [vmem:[#allocation2 + $0x6] sm:$0x3] }
 0x652   :  { %3021 = vtanh.f32 %v674_v11 }
 0x653   :  { %v843_v14 = vpop.permute.xlu1 %842 }
 0x654   :  { %v845_v15 = vadd.f32 %v843_v14, %v835_v13 }
 0x656   :  { %3023 = vtanh.f32 %v845_v15 }
 0x65f   :  { %v3022_v16 = vpop.eup %3021 }
 0x660   :  { %677 = vrot.lane.b32.xlu0 %v3022_v16, %s3217_s0 }
 0x663   :  { %v3024_v17 = vpop.eup %3023 }
 0x664   :  { %848 = vrot.lane.b32.xlu1 %v3024_v17, %s3217_s0 }
 0x6d2   :  { %v678_v18 = vpop.permute.xlu0 %677 }
 0x6d3   :  { %v680_v19 = vmul.f32 %v678_v18, %v660_v63 }
 0x6d5   :  { %682 = vrot.lane.b32.xlu0 %v680_v19, %s3218_s17 }
 0x6d6   :  { %v849_v20 = vpop.permute.xlu1 %848 }
 0x6d7   :  { %v851_v21 = vmul.f32 %v849_v20, %v834_v3 }
 0x6d9   :  { %853 = vrot.lane.b32.xlu1 %v851_v21, %s3218_s17 }
 0x747   :  { %v683_v22 = vpop.permute.xlu0 %682 }
 0x748   :  { %686 = vst.msk [vmem:[#allocation3] sm:$0x3] %vm685_vm10, %v683_v22  ;;  %2887 = vmatmul.mubr.msk.f32.vlgmr.msra.gmra.mxu0 %vm219_vm5, %v683_v22 }
 0x749   :  { %2895 = vmatpush3.msra.mxu0 %v3387_v43  ;;  %2896 = vmatprep.mubr.msk.f32.mxu0 %vm3212_vm0, %v3211_v0 }
 0x74a   :  { %2904 = vmatprep.subr.mxu0 %v3211_v0 }
 0x74b   :  { %v854_v23 = vpop.permute.xlu1 %853 }
 0x74c   :  { %2897 = vmatmul.mubr.msk.f32.vlgmr.msra.gmra.mxu0 %vm219_vm5, %v854_v23 }
 0x74d   :  { %2905 = vmatpush3.msra.mxu0 %v3352_v12  ;;  %2906 = vmatprep.mubr.msk.f32.mxu0 %vm3212_vm0, %v3211_v0 }
 0x74e   :  { %2914 = vmatprep.subr.mxu0 %v3211_v0 }
 0x750   :  { %2907 = vmatmul.mubr.msk.f32.vlgmr.msra.gmra.mxu0 %vm219_vm5, %v854_v23 }
 0x751   :  { %2915 = vmatpush3.msra.mxu0 %v3368_v32  ;;  %2916 = vmatprep.mubr.msk.f32.mxu0 %vm3212_vm0, %v3211_v0 }
 0x752   :  { %2924 = vmatprep.subr.mxu0 %v3211_v0 }
 0x808   :  { %v755_v24 = vpop.f32.mrf.mxu0 }
 0x809   :  { %v756_v27 = vadd.f32 %v3403_v50, %v755_v24 }
 0x80a   :  { %v2888_v25 = vpop.f32.mrf.mxu0 }
 0x80c   :  { %v923_v28 = vpop.f32.mrf.mxu0 }
 0x80d   :  { %v927_v29 = vadd.f32 %v923_v28, %v756_v27 }
 0x80e   :  { %v2898_v30 = vpop.f32.mrf.mxu0 }
 0x80f   :  { %v928_v31 = vmul.f32 %v927_v29, %v3362_v26 }
 0x810   :  { %v1093_v35 = vpop.f32.mrf.mxu0 }
 0x811   :  { %3025 = vtanh.f32 %v928_v31  ;;  %v1097_v36 = vadd.f32 %v1093_v35, %v1026_v33 }
 0x812   :  { %v2908_v37 = vpop.f32.mrf.mxu0 }
 0x813   :  { %v1098_v38 = vmul.f32 %v1097_v36, %v3362_v26 }
 0x815   :  { %3027 = vtanh.f32 %v1098_v38 }
 0x81e   :  { %v3026_v39 = vpop.eup %3025 }
 0x81f   :  { %v930_v40 = vmul.f32 %v3026_v39, %v3362_v26 }
 0x821   :  { %v931_v41 = vadd.f32 %v930_v40, %v3374_v34 }
 0x822   :  { %v3028_v42 = vpop.eup %3027 }
 0x823   :  { %934 = vrot.lane.b32.xlu0 %v931_v41, %s3214_s27  ;;  %v1100_v44 = vmul.f32 %v3028_v42, %v3362_v26  ;;  %v932_v51 = vmul.f32 %v931_v41, %v674_v11 }
 0x825   :  { %v1101_v45 = vadd.f32 %v1100_v44, %v3374_v34 }
 0x827   :  { %1104 = vrot.lane.b32.xlu1 %v1101_v45, %s3214_s27  ;;  %v1102_v54 = vmul.f32 %v1101_v45, %v845_v15 }
 0x895   :  { %v935_v46 = vpop.permute.xlu0 %934 }
 0x896   :  { %v937_v47 = vmul.f32 %v935_v46, %v931_v41 }
 0x898   :  { %939 = vrot.lane.b32.xlu0 %v937_v47, %s3216_s28 }
 0x899   :  { %v1105_v48 = vpop.permute.xlu1 %1104 }
 0x89a   :  { %v1107_v49 = vmul.f32 %v1105_v48, %v1101_v45 }
 0x89c   :  { %1109 = vrot.lane.b32.xlu1 %v1107_v49, %s3216_s28 }
 0x90a   :  { %v940_v52 = vpop.permute.xlu0 %939 }
 0x90b   :  { %v942_v53 = vadd.f32 %v940_v52, %v932_v51  ;;  %v1560_v51 = vld [vmem:[#allocation2 + $0x8] sm:$0x3] }
 0x90d   :  { %3029 = vtanh.f32 %v942_v53 }
 0x90e   :  { %v1110_v55 = vpop.permute.xlu1 %1109 }
 0x90f   :  { %v1112_v56 = vadd.f32 %v1110_v55, %v1102_v54 }
 0x911   :  { %3031 = vtanh.f32 %v1112_v56 }
 0x91a   :  { %v3030_v57 = vpop.eup %3029 }
 0x91b   :  { %945 = vrot.lane.b32.xlu0 %v3030_v57, %s3217_s0 }
 0x91e   :  { %v3032_v58 = vpop.eup %3031 }
 0x91f   :  { %1115 = vrot.lane.b32.xlu1 %v3032_v58, %s3217_s0 }
 0x98d   :  { %v946_v59 = vpop.permute.xlu0 %945 }
 0x98e   :  { %v948_v60 = vmul.f32 %v946_v59, %v931_v41 }
 0x990   :  { %950 = vrot.lane.b32.xlu0 %v948_v60, %s3218_s17 }
 0x991   :  { %v1116_v61 = vpop.permute.xlu1 %1115 }
 0x992   :  { %v1118_v62 = vmul.f32 %v1116_v61, %v1101_v45 }
 0x994   :  { %1120 = vrot.lane.b32.xlu1 %v1118_v62, %s3218_s17 }
 0xa02   :  { %v951_v63 = vpop.permute.xlu0 %950 }
 0xa03   :  { %953 = vst.msk [vmem:[#allocation3 + $0x2] sm:$0x3] %vm685_vm10, %v951_v63  ;;  %2902 = vmatmul.mubr.msk.f32.vlgmr.msra.gmra.mxu1 %vm219_vm5, %v951_v63 }
 0xa04   :  { %2910 = vmatpush3.msra.mxu1 %v3387_v43  ;;  %2911 = vmatprep.mubr.msk.f32.mxu1 %vm3212_vm0, %v3211_v0 }
 0xa05   :  { %2919 = vmatprep.subr.mxu1 %v3211_v0 }
 0xa06   :  { %v1121_v1 = vpop.permute.xlu1 %1120 }
 0xa07   :  { %2912 = vmatmul.mubr.msk.f32.vlgmr.msra.gmra.mxu1 %vm219_vm5, %v1121_v1 }
 0xa08   :  { %2920 = vmatpush3.msra.mxu1 %v3352_v12  ;;  %2921 = vmatprep.mubr.msk.f32.mxu1 %vm3212_vm0, %v3211_v0 }
 0xa09   :  { %2929 = vmatprep.subr.mxu1 %v3211_v0 }
 0xa0b   :  { %2922 = vmatmul.mubr.msk.f32.vlgmr.msra.gmra.mxu1 %vm219_vm5, %v1121_v1 }
 0xa0c   :  { %2930 = vmatpush3.msra.mxu1 %v3368_v32  ;;  %2931 = vmatprep.mubr.msk.f32.mxu1 %vm3212_vm0, %v3211_v0 }
 0xa0d   :  { %2939 = vmatprep.subr.mxu1 %v3211_v0 }
 0xac3   :  { %v1022_v2 = vpop.f32.mrf.mxu1 }
 0xac4   :  { %v1023_v4 = vadd.f32 %v3403_v50, %v1022_v2 }
 0xac5   :  { %v2903_v3 = vpop.f32.mrf.mxu1 }
 0xac7   :  { %v1190_v5 = vpop.f32.mrf.mxu1 }
 0xac8   :  { %v1194_v6 = vadd.f32 %v1190_v5, %v1023_v4 }
 0xac9   :  { %v2913_v7 = vpop.f32.mrf.mxu1 }
 0xaca   :  { %v1195_v8 = vmul.f32 %v1194_v6, %v3362_v26 }
 0xacb   :  { %v1360_v10 = vpop.f32.mrf.mxu1 }
 0xacc   :  { %3033 = vtanh.f32 %v1195_v8  ;;  %v1364_v11 = vadd.f32 %v1360_v10, %v1293_v9 }
 0xacd   :  { %v2923_v13 = vpop.f32.mrf.mxu1 }
 0xace   :  { %v1365_v14 = vmul.f32 %v1364_v11, %v3362_v26 }
 0xad0   :  { %3035 = vtanh.f32 %v1365_v14 }
 0xad9   :  { %v3034_v15 = vpop.eup %3033 }
 0xada   :  { %v1197_v16 = vmul.f32 %v3034_v15, %v3362_v26 }
 0xadc   :  { %v1198_v17 = vadd.f32 %v1197_v16, %v3374_v34 }
 0xadd   :  { %v3036_v18 = vpop.eup %3035 }
 0xade   :  { %1201 = vrot.lane.b32.xlu0 %v1198_v17, %s3214_s27  ;;  %v1367_v19 = vmul.f32 %v3036_v18, %v3362_v26  ;;  %v1199_v25 = vmul.f32 %v1198_v17, %v942_v53 }
 0xae0   :  { %v1368_v20 = vadd.f32 %v1367_v19, %v3374_v34 }
 0xae2   :  { %1371 = vrot.lane.b32.xlu1 %v1368_v20, %s3214_s27  ;;  %v1369_v29 = vmul.f32 %v1368_v20, %v1112_v56 }
 0xb50   :  { %v1202_v21 = vpop.permute.xlu0 %1201 }
 0xb51   :  { %v1204_v22 = vmul.f32 %v1202_v21, %v1198_v17 }
 0xb53   :  { %1206 = vrot.lane.b32.xlu0 %v1204_v22, %s3216_s28 }
 0xb54   :  { %v1372_v23 = vpop.permute.xlu1 %1371 }
 0xb55   :  { %v1374_v24 = vmul.f32 %v1372_v23, %v1368_v20 }
 0xb57   :  { %1376 = vrot.lane.b32.xlu1 %v1374_v24, %s3216_s28 }
 0xbc5   :  { %v1207_v27 = vpop.permute.xlu0 %1206 }
 0xbc6   :  { %v1209_v28 = vadd.f32 %v1207_v27, %v1199_v25  ;;  %v1827_v25 = vld [vmem:[#allocation2 + $0xa] sm:$0x3] }
 0xbc8   :  { %3037 = vtanh.f32 %v1209_v28 }
 0xbc9   :  { %v1377_v30 = vpop.permute.xlu1 %1376 }
 0xbca   :  { %v1379_v31 = vadd.f32 %v1377_v30, %v1369_v29 }
 0xbcc   :  { %3039 = vtanh.f32 %v1379_v31 }
 0xbd5   :  { %v3038_v33 = vpop.eup %3037 }
 0xbd6   :  { %1212 = vrot.lane.b32.xlu0 %v3038_v33, %s3217_s0 }
 0xbd9   :  { %v3040_v35 = vpop.eup %3039 }
 0xbda   :  { %1382 = vrot.lane.b32.xlu1 %v3040_v35, %s3217_s0 }
 0xc48   :  { %v1213_v36 = vpop.permute.xlu0 %1212 }
 0xc49   :  { %v1215_v37 = vmul.f32 %v1213_v36, %v1198_v17 }
 0xc4b   :  { %1217 = vrot.lane.b32.xlu0 %v1215_v37, %s3218_s17 }
 0xc4c   :  { %v1383_v38 = vpop.permute.xlu1 %1382 }
 0xc4d   :  { %v1385_v39 = vmul.f32 %v1383_v38, %v1368_v20 }
 0xc4f   :  { %1387 = vrot.lane.b32.xlu1 %v1385_v39, %s3218_s17 }
 0xcbd   :  { %v1218_v40 = vpop.permute.xlu0 %1217 }
 0xcbe   :  { %1220 = vst.msk [vmem:[#allocation3 + $0x4] sm:$0x3] %vm685_vm10, %v1218_v40  ;;  %2917 = vmatmul.mubr.msk.f32.vlgmr.msra.gmra.mxu0 %vm219_vm5, %v1218_v40 }
 0xcbf   :  { %2925 = vmatpush3.msra.mxu0 %v3387_v43  ;;  %2926 = vmatprep.mubr.msk.f32.mxu0 %vm3212_vm0, %v3211_v0 }
 0xcc0   :  { %2934 = vmatprep.subr.mxu0 %v3211_v0 }
 0xcc1   :  { %v1388_v41 = vpop.permute.xlu1 %1387 }
 0xcc2   :  { %2927 = vmatmul.mubr.msk.f32.vlgmr.msra.gmra.mxu0 %vm219_vm5, %v1388_v41 }
 0xcc3   :  { %2935 = vmatpush3.msra.mxu0 %v3352_v12  ;;  %2936 = vmatprep.mubr.msk.f32.mxu0 %vm3212_vm0, %v3211_v0 }
 0xcc4   :  { %2944 = vmatprep.subr.mxu0 %v3211_v0 }
 0xcc6   :  { %2937 = vmatmul.mubr.msk.f32.vlgmr.msra.gmra.mxu0 %vm219_vm5, %v1388_v41 }
 0xcc7   :  { %2945 = vmatpush3.msra.mxu0 %v3368_v32  ;;  %2946 = vmatprep.mubr.msk.f32.mxu0 %vm3212_vm0, %v3211_v0 }
 0xcc8   :  { %2954 = vmatprep.subr.mxu0 %v3211_v0 }
 0xd7e   :  { %v1289_v42 = vpop.f32.mrf.mxu0 }
 0xd7f   :  { %v1290_v45 = vadd.f32 %v3403_v50, %v1289_v42 }
 0xd80   :  { %v2918_v44 = vpop.f32.mrf.mxu0 }
 0xd82   :  { %v1457_v46 = vpop.f32.mrf.mxu0 }
 0xd83   :  { %v1461_v47 = vadd.f32 %v1457_v46, %v1290_v45 }
 0xd84   :  { %v2928_v48 = vpop.f32.mrf.mxu0 }
 0xd85   :  { %v1462_v49 = vmul.f32 %v1461_v47, %v3362_v26 }
 0xd86   :  { %v1627_v52 = vpop.f32.mrf.mxu0 }
 0xd87   :  { %3041 = vtanh.f32 %v1462_v49  ;;  %v1631_v53 = vadd.f32 %v1627_v52, %v1560_v51 }
 0xd88   :  { %v2938_v54 = vpop.f32.mrf.mxu0 }
 0xd89   :  { %v1632_v55 = vmul.f32 %v1631_v53, %v3362_v26 }
 0xd8b   :  { %3043 = vtanh.f32 %v1632_v55 }
 0xd94   :  { %v3042_v56 = vpop.eup %3041 }
 0xd95   :  { %v1464_v57 = vmul.f32 %v3042_v56, %v3362_v26 }
 0xd97   :  { %v1465_v58 = vadd.f32 %v1464_v57, %v3374_v34 }
 0xd98   :  { %v3044_v59 = vpop.eup %3043 }
 0xd99   :  { %1468 = vrot.lane.b32.xlu0 %v1465_v58, %s3214_s27  ;;  %v1634_v60 = vmul.f32 %v3044_v59, %v3362_v26  ;;  %v1466_v3 = vmul.f32 %v1465_v58, %v1209_v28 }
 0xd9b   :  { %v1635_v61 = vadd.f32 %v1634_v60, %v3374_v34 }
 0xd9d   :  { %1638 = vrot.lane.b32.xlu1 %v1635_v61, %s3214_s27  ;;  %v1636_v6 = vmul.f32 %v1635_v61, %v1379_v31 }
 0xe0b   :  { %v1469_v62 = vpop.permute.xlu0 %1468 }
 0xe0c   :  { %v1471_v63 = vmul.f32 %v1469_v62, %v1465_v58 }
 0xe0e   :  { %1473 = vrot.lane.b32.xlu0 %v1471_v63, %s3216_s28 }
 0xe0f   :  { %v1639_v1 = vpop.permute.xlu1 %1638 }
 0xe10   :  { %v1641_v2 = vmul.f32 %v1639_v1, %v1635_v61 }
 0xe12   :  { %1643 = vrot.lane.b32.xlu1 %v1641_v2, %s3216_s28 }
 0xe80   :  { %v1474_v4 = vpop.permute.xlu0 %1473 }
 0xe81   :  { %v1476_v5 = vadd.f32 %v1474_v4, %v1466_v3  ;;  %v2094_v3 = vld [vmem:[#allocation2 + $0xc] sm:$0x3] }
 0xe83   :  { %3045 = vtanh.f32 %v1476_v5 }
 0xe84   :  { %v1644_v7 = vpop.permute.xlu1 %1643 }
 0xe85   :  { %v1646_v8 = vadd.f32 %v1644_v7, %v1636_v6 }
 0xe87   :  { %3047 = vtanh.f32 %v1646_v8 }
 0xe90   :  { %v3046_v9 = vpop.eup %3045 }
 0xe91   :  { %1479 = vrot.lane.b32.xlu0 %v3046_v9, %s3217_s0 }
 0xe94   :  { %v3048_v10 = vpop.eup %3047 }
 0xe95   :  { %1649 = vrot.lane.b32.xlu1 %v3048_v10, %s3217_s0 }
 0xf03   :  { %v1480_v11 = vpop.permute.xlu0 %1479 }
 0xf04   :  { %v1482_v13 = vmul.f32 %v1480_v11, %v1465_v58 }
 0xf06   :  { %1484 = vrot.lane.b32.xlu0 %v1482_v13, %s3218_s17 }
 0xf07   :  { %v1650_v14 = vpop.permute.xlu1 %1649 }
 0xf08   :  { %v1652_v15 = vmul.f32 %v1650_v14, %v1635_v61 }
 0xf0a   :  { %1654 = vrot.lane.b32.xlu1 %v1652_v15, %s3218_s17 }
 0xf78   :  { %v1485_v16 = vpop.permute.xlu0 %1484 }
 0xf79   :  { %1487 = vst.msk [vmem:[#allocation3 + $0x6] sm:$0x3] %vm685_vm10, %v1485_v16  ;;  %2932 = vmatmul.mubr.msk.f32.vlgmr.msra.gmra.mxu1 %vm219_vm5, %v1485_v16 }
 0xf7a   :  { %2940 = vmatpush3.msra.mxu1 %v3387_v43  ;;  %2941 = vmatprep.mubr.msk.f32.mxu1 %vm3212_vm0, %v3211_v0 }
 0xf7b   :  { %2949 = vmatprep.subr.mxu1 %v3211_v0 }
 0xf7c   :  { %v1655_v17 = vpop.permute.xlu1 %1654 }
 0xf7d   :  { %2942 = vmatmul.mubr.msk.f32.vlgmr.msra.gmra.mxu1 %vm219_vm5, %v1655_v17 }
 0xf7e   :  { %2950 = vmatpush3.msra.mxu1 %v3352_v12  ;;  %2951 = vmatprep.mubr.msk.f32.mxu1 %vm3212_vm0, %v3211_v0 }
 0xf7f   :  { %2959 = vmatprep.subr.mxu1 %v3211_v0 }
 0xf81   :  { %2952 = vmatmul.mubr.msk.f32.vlgmr.msra.gmra.mxu1 %vm219_vm5, %v1655_v17 }
 0xf82   :  { %2960 = vmatpush3.msra.mxu1 %v3368_v32  ;;  %2961 = vmatprep.mubr.msk.f32.mxu1 %vm3212_vm0, %v3211_v0 }
 0xf83   :  { %2969 = vmatprep.subr.mxu1 %v3211_v0 }
0x1039   :  { %v1556_v18 = vpop.f32.mrf.mxu1 }
0x103a   :  { %v1557_v20 = vadd.f32 %v3403_v50, %v1556_v18 }
0x103b   :  { %v2933_v19 = vpop.f32.mrf.mxu1 }
0x103d   :  { %v1724_v21 = vpop.f32.mrf.mxu1 }
0x103e   :  { %v1728_v22 = vadd.f32 %v1724_v21, %v1557_v20 }
0x103f   :  { %v2943_v23 = vpop.f32.mrf.mxu1 }
0x1040   :  { %v1729_v24 = vmul.f32 %v1728_v22, %v3362_v26 }
0x1041   :  { %v1894_v27 = vpop.f32.mrf.mxu1 }
0x1042   :  { %3049 = vtanh.f32 %v1729_v24  ;;  %v1898_v28 = vadd.f32 %v1894_v27, %v1827_v25 }
0x1043   :  { %v2953_v29 = vpop.f32.mrf.mxu1 }
0x1044   :  { %v1899_v30 = vmul.f32 %v1898_v28, %v3362_v26 }
0x1046   :  { %3051 = vtanh.f32 %v1899_v30 }
0x104f   :  { %v3050_v31 = vpop.eup %3049 }
0x1050   :  { %v1731_v33 = vmul.f32 %v3050_v31, %v3362_v26 }
0x1052   :  { %v1732_v35 = vadd.f32 %v1731_v33, %v3374_v34 }
0x1053   :  { %v3052_v36 = vpop.eup %3051 }
0x1054   :  { %1735 = vrot.lane.b32.xlu0 %v1732_v35, %s3214_s27  ;;  %v1901_v37 = vmul.f32 %v3052_v36, %v3362_v26  ;;  %v1733_v44 = vmul.f32 %v1732_v35, %v1476_v5 }
0x1056   :  { %v1902_v38 = vadd.f32 %v1901_v37, %v3374_v34 }
0x1058   :  { %1905 = vrot.lane.b32.xlu1 %v1902_v38, %s3214_s27  ;;  %v1903_v47 = vmul.f32 %v1902_v38, %v1646_v8 }
0x10c6   :  { %v1736_v39 = vpop.permute.xlu0 %1735 }
0x10c7   :  { %v1738_v40 = vmul.f32 %v1736_v39, %v1732_v35 }
0x10c9   :  { %1740 = vrot.lane.b32.xlu0 %v1738_v40, %s3216_s28 }
0x10ca   :  { %v1906_v41 = vpop.permute.xlu1 %1905 }
0x10cb   :  { %v1908_v42 = vmul.f32 %v1906_v41, %v1902_v38 }
0x10cd   :  { %1910 = vrot.lane.b32.xlu1 %v1908_v42, %s3216_s28 }
0x113b   :  { %v1741_v45 = vpop.permute.xlu0 %1740 }
0x113c   :  { %v1743_v46 = vadd.f32 %v1741_v45, %v1733_v44  ;;  %v2361_v44 = vld [vmem:[#allocation2 + $0xe] sm:$0x3] }
0x113e   :  { %3053 = vtanh.f32 %v1743_v46 }
0x113f   :  { %v1911_v48 = vpop.permute.xlu1 %1910 }
0x1140   :  { %v1913_v49 = vadd.f32 %v1911_v48, %v1903_v47 }
0x1142   :  { %3055 = vtanh.f32 %v1913_v49 }
0x114b   :  { %v3054_v51 = vpop.eup %3053 }
0x114c   :  { %1746 = vrot.lane.b32.xlu0 %v3054_v51, %s3217_s0 }
0x114f   :  { %v3056_v52 = vpop.eup %3055 }
0x1150   :  { %1916 = vrot.lane.b32.xlu1 %v3056_v52, %s3217_s0 }
0x11be   :  { %v1747_v53 = vpop.permute.xlu0 %1746 }
0x11bf   :  { %v1749_v54 = vmul.f32 %v1747_v53, %v1732_v35  ;;  %v2556_v35 = vld [vmem:[#allocation3] sm:$0xff] }
0x11c1   :  { %1751 = vrot.lane.b32.xlu0 %v1749_v54, %s3218_s17 }
0x11c2   :  { %v1917_v55 = vpop.permute.xlu1 %1916 }
0x11c3   :  { %v1919_v56 = vmul.f32 %v1917_v55, %v1902_v38 }
0x11c5   :  { %1921 = vrot.lane.b32.xlu1 %v1919_v56, %s3218_s17 }
0x1233   :  { %v1752_v57 = vpop.permute.xlu0 %1751 }
0x1234   :  { %1754 = vst.msk [vmem:[#allocation3 + $0x8] sm:$0x3] %vm685_vm10, %v1752_v57  ;;  %2947 = vmatmul.mubr.msk.f32.vlgmr.msra.gmra.mxu0 %vm219_vm5, %v1752_v57 }
0x1235   :  { %2955 = vmatpush3.msra.mxu0 %v3387_v43  ;;  %2956 = vmatprep.mubr.msk.f32.mxu0 %vm3212_vm0, %v3211_v0 }
0x1236   :  { %2964 = vmatprep.subr.mxu0 %v3211_v0 }
0x1237   :  { %v1922_v58 = vpop.permute.xlu1 %1921 }
0x1238   :  { %2957 = vmatmul.mubr.msk.f32.vlgmr.msra.gmra.mxu0 %vm219_vm5, %v1922_v58 }
0x1239   :  { %2965 = vmatpush3.msra.mxu0 %v3352_v12  ;;  %2966 = vmatprep.mubr.msk.f32.mxu0 %vm3212_vm0, %v3211_v0 }
0x123a   :  { %2974 = vmatprep.subr.mxu0 %v3211_v0 }
0x123c   :  { %2967 = vmatmul.mubr.msk.f32.vlgmr.msra.gmra.mxu0 %vm219_vm5, %v1922_v58 }
0x123d   :  { %2975 = vmatpush3.msra.mxu0 %v3368_v32  ;;  %2976 = vmatprep.mubr.msk.f32.mxu0 %vm3212_vm0, %v3211_v0 }
0x123e   :  { %2984 = vmatprep.subr.mxu0 %v3211_v0 }
0x12f4   :  { %v1823_v59 = vpop.f32.mrf.mxu0 }
0x12f5   :  { %v1824_v61 = vadd.f32 %v3403_v50, %v1823_v59 }
0x12f6   :  { %v2948_v60 = vpop.f32.mrf.mxu0 }
0x12f8   :  { %v1991_v62 = vpop.f32.mrf.mxu0 }
0x12f9   :  { %v1995_v63 = vadd.f32 %v1991_v62, %v1824_v61 }
0x12fa   :  { %v2958_v1 = vpop.f32.mrf.mxu0 }
0x12fb   :  { %v1996_v2 = vmul.f32 %v1995_v63, %v3362_v26 }
0x12fc   :  { %v2161_v4 = vpop.f32.mrf.mxu0 }
0x12fd   :  { %3057 = vtanh.f32 %v1996_v2  ;;  %v2165_v5 = vadd.f32 %v2161_v4, %v2094_v3 }
0x12fe   :  { %v2968_v6 = vpop.f32.mrf.mxu0 }
0x12ff   :  { %v2166_v32 = vmul.f32 %v2165_v5, %v3362_v26 }
0x1301   :  { %3059 = vtanh.f32 %v2166_v32 }
0x130a   :  { %v3058_v7 = vpop.eup %3057 }
0x130b   :  { %v1998_v8 = vmul.f32 %v3058_v7, %v3362_v26 }
0x130d   :  { %v1999_v9 = vadd.f32 %v1998_v8, %v3374_v34 }
0x130e   :  { %v3060_v10 = vpop.eup %3059 }
0x130f   :  { %2002 = vrot.lane.b32.xlu0 %v1999_v9, %s3214_s27  ;;  %v2168_v11 = vmul.f32 %v3060_v10, %v3362_v26  ;;  %v2000_v18 = vmul.f32 %v1999_v9, %v1743_v46 }
0x1311   :  { %v2169_v13 = vadd.f32 %v2168_v11, %v3374_v34 }
0x1313   :  { %2172 = vrot.lane.b32.xlu1 %v2169_v13, %s3214_s27  ;;  %v2170_v21 = vmul.f32 %v2169_v13, %v1913_v49 }
0x1381   :  { %v2003_v14 = vpop.permute.xlu0 %2002 }
0x1382   :  { %v2005_v15 = vmul.f32 %v2003_v14, %v1999_v9 }
0x1384   :  { %2007 = vrot.lane.b32.xlu0 %v2005_v15, %s3216_s28 }
0x1385   :  { %v2173_v16 = vpop.permute.xlu1 %2172 }
0x1386   :  { %v2175_v17 = vmul.f32 %v2173_v16, %v2169_v13 }
0x1388   :  { %2177 = vrot.lane.b32.xlu1 %v2175_v17, %s3216_s28 }
0x13f6   :  { %v2008_v19 = vpop.permute.xlu0 %2007 }
0x13f7   :  { %v2010_v20 = vadd.f32 %v2008_v19, %v2000_v18 }
0x13f9   :  { %3061 = vtanh.f32 %v2010_v20 }
0x13fa   :  { %v2178_v22 = vpop.permute.xlu1 %2177 }
0x13fb   :  { %v2180_v23 = vadd.f32 %v2178_v22, %v2170_v21 }
0x13fd   :  { %3063 = vtanh.f32 %v2180_v23 }
0x1406   :  { %v3062_v24 = vpop.eup %3061 }
0x1407   :  { %2013 = vrot.lane.b32.xlu0 %v3062_v24, %s3217_s0 }
0x140a   :  { %v3064_v25 = vpop.eup %3063 }
0x140b   :  { %2183 = vrot.lane.b32.xlu1 %v3064_v25, %s3217_s0 }
0x1479   :  { %v2014_v27 = vpop.permute.xlu0 %2013 }
0x147a   :  { %v2016_v28 = vmul.f32 %v2014_v27, %v1999_v9  ;;  %v2649_v27 = vld [vmem:[%s3656_s14] sm:$0xf] }
0x147c   :  { %2018 = vrot.lane.b32.xlu0 %v2016_v28, %s3218_s17  ;;  %v2786_v28 = vld [vmem:[%s3655_s13] ss:$0 sm:$0xff] }
0x147d   :  { %v2184_v29 = vpop.permute.xlu1 %2183 }
0x147e   :  { %v2186_v30 = vmul.f32 %v2184_v29, %v2169_v13 }
0x1480   :  { %2188 = vrot.lane.b32.xlu1 %v2186_v30, %s3218_s17 }
0x14ee   :  { %v2019_v31 = vpop.permute.xlu0 %2018 }
0x14ef   :  { %2021 = vst.msk [vmem:[#allocation3 + $0xa] sm:$0x3] %vm685_vm10, %v2019_v31  ;;  %2962 = vmatmul.mubr.msk.f32.vlgmr.msra.gmra.mxu1 %vm219_vm5, %v2019_v31 }
0x14f0   :  { %2970 = vmatpush3.msra.mxu1 %v3387_v43  ;;  %2971 = vmatprep.mubr.msk.f32.mxu1 %vm3212_vm0, %v3211_v0 }
0x14f1   :  { %2979 = vmatprep.subr.mxu1 %v3211_v0 }
0x14f2   :  { %v2189_v33 = vpop.permute.xlu1 %2188 }
0x14f3   :  { %2972 = vmatmul.mubr.msk.f32.vlgmr.msra.gmra.mxu1 %vm219_vm5, %v2189_v33 }
0x14f4   :  { %2980 = vmatpush3.msra.mxu1 %v3352_v12  ;;  %2981 = vmatprep.mubr.msk.f32.mxu1 %vm3212_vm0, %v3211_v0 }
0x14f7   :  { %2982 = vmatmul.mubr.msk.f32.vlgmr.msra.gmra.mxu1 %vm219_vm5, %v2189_v33 }
0x14f8   :  { %2991 = vmatprep.mubr.msk.f32.mxu1 %vm219_vm5, %v2556_v35 }
0x15af   :  { %v2090_v36 = vpop.f32.mrf.mxu1 }
0x15b0   :  { %v2091_v38 = vadd.f32 %v3403_v50, %v2090_v36 }
0x15b1   :  { %v2963_v37 = vpop.f32.mrf.mxu1 }
0x15b2   :  { %v2789_v37 = vld [vmem:[%s3657_s15] ss:$0 sm:$0xff] }
0x15b3   :  { %v2258_v39 = vpop.f32.mrf.mxu1 }
0x15b4   :  { %v2262_v40 = vadd.f32 %v2258_v39, %v2091_v38 }
0x15b5   :  { %v2973_v41 = vpop.f32.mrf.mxu1 }
0x15b6   :  { %v2263_v42 = vmul.f32 %v2262_v40, %v3362_v26 }
0x15b7   :  { %v2428_v45 = vpop.f32.mrf.mxu1 }
0x15b8   :  { %3065 = vtanh.f32 %v2263_v42  ;;  %v2432_v12 = vadd.f32 %v2428_v45, %v2361_v44 }
0x15b9   :  { %v2983_v46 = vpop.f32.mrf.mxu1 }
0x15ba   :  { %v2433_v47 = vmul.f32 %v2432_v12, %v3362_v26 }
0x15bc   :  { %3067 = vtanh.f32 %v2433_v47 }
0x15c5   :  { %v3066_v48 = vpop.eup %3065 }
0x15c6   :  { %v2265_v49 = vmul.f32 %v3066_v48, %v3362_v26 }
0x15c8   :  { %v2266_v51 = vadd.f32 %v2265_v49, %v3374_v34 }
0x15c9   :  { %v3068_v52 = vpop.eup %3067 }
0x15ca   :  { %2269 = vrot.lane.b32.xlu0 %v2266_v51, %s3214_s27  ;;  %v2435_v53 = vmul.f32 %v3068_v52, %v3362_v26  ;;  %v2267_v59 = vmul.f32 %v2266_v51, %v2010_v20 }
0x15cc   :  { %v2436_v54 = vadd.f32 %v2435_v53, %v3374_v34 }
0x15ce   :  { %2439 = vrot.lane.b32.xlu1 %v2436_v54, %s3214_s27  ;;  %v2437_v62 = vmul.f32 %v2436_v54, %v2180_v23  ;;  %v2558_v23 = vld [vmem:[%s3654_s12] sm:$0xff] }
0x15cf   :  { %2989 = vmatprep.subr.mxu1 %v2558_v23 }
0x15d0   :  { %2990 = vmatpush3.msra.mxu1 %v2558_v23 }
0x163c   :  { %v2270_v55 = vpop.permute.xlu0 %2269 }
0x163d   :  { %v2272_v56 = vmul.f32 %v2270_v55, %v2266_v51 }
0x163f   :  { %2274 = vrot.lane.b32.xlu0 %v2272_v56, %s3216_s28 }
0x1640   :  { %v2440_v57 = vpop.permute.xlu1 %2439 }
0x1641   :  { %v2442_v58 = vmul.f32 %v2440_v57, %v2436_v54 }
0x1643   :  { %2444 = vrot.lane.b32.xlu1 %v2442_v58, %s3216_s28 }
0x16b1   :  { %v2275_v60 = vpop.permute.xlu0 %2274 }
0x16b2   :  { %v2277_v61 = vadd.f32 %v2275_v60, %v2267_v59 }
0x16b4   :  { %3069 = vtanh.f32 %v2277_v61 }
0x16b5   :  { %v2445_v63 = vpop.permute.xlu1 %2444 }
0x16b6   :  { %v2447_v1 = vadd.f32 %v2445_v63, %v2437_v62 }
0x16b8   :  { %3071 = vtanh.f32 %v2447_v1 }
0x16c1   :  { %v3070_v2 = vpop.eup %3069 }
0x16c2   :  { %2280 = vrot.lane.b32.xlu0 %v3070_v2, %s3217_s0 }
0x16c5   :  { %v3072_v3 = vpop.eup %3071 }
0x16c6   :  { %2450 = vrot.lane.b32.xlu1 %v3072_v3, %s3217_s0 }
0x1734   :  { %v2281_v4 = vpop.permute.xlu0 %2280 }
0x1735   :  { %v2283_v5 = vmul.f32 %v2281_v4, %v2266_v51 }
0x1737   :  { %2285 = vrot.lane.b32.xlu0 %v2283_v5, %s3218_s17 }
0x1738   :  { %v2451_v6 = vpop.permute.xlu1 %2450 }
0x1739   :  { %v2453_v32 = vmul.f32 %v2451_v6, %v2436_v54 }
0x173b   :  { %2455 = vrot.lane.b32.xlu1 %v2453_v32, %s3218_s17 }
0x17a9   :  { %v2286_v7 = vpop.permute.xlu0 %2285 }
0x17aa   :  { %2288 = vst.msk [vmem:[#allocation3 + $0xc] sm:$0x3] %vm685_vm10, %v2286_v7  ;;  %2977 = vmatmul.mubr.msk.f32.vlgmr.msra.gmra.mxu0 %vm219_vm5, %v2286_v7 }
0x17ab   :  { %2985 = vmatpush3.msra.mxu0 %v3387_v43  ;;  %2986 = vmatprep.mubr.msk.f32.mxu0 %vm3212_vm0, %v3211_v0 }
0x17ac   :  { %2994 = vmatprep.subr.msk.mxu0 %vm136_vm1, %v2649_v27 }
0x17ad   :  { %v2456_v8 = vpop.permute.xlu1 %2455 }
0x17ae   :  { %2987 = vmatmul.mubr.msk.f32.vlgmr.msra.gmra.mxu0 %vm219_vm5, %v2456_v8 }
0x17af   :  { %2995 = vmatpush3.msk.msra.mxu0 %vm136_vm1, %v2649_v27 }
0x186a   :  { %v2357_v9 = vpop.f32.mrf.mxu0 }
0x186b   :  { %v2358_v11 = vadd.f32 %v3403_v50, %v2357_v9 }
0x186c   :  { %v2978_v10 = vpop.f32.mrf.mxu0 }
0x186e   :  { %v2525_v13 = vpop.f32.mrf.mxu0 }
0x186f   :  { %v2529_v14 = vadd.f32 %v2525_v13, %v2358_v11 }
0x1870   :  { %v2988_v15 = vpop.f32.mrf.mxu0 }
0x1871   :  { %v2530_v16 = vmul.f32 %v2529_v14, %v3362_v26 }
0x1873   :  { %3073 = vtanh.f32 %v2530_v16 }
0x1880   :  { %v3074_v17 = vpop.eup %3073 }
0x1881   :  { %v2532_v18 = vmul.f32 %v3074_v17, %v3362_v26 }
0x1883   :  { %v2533_v43 = vadd.f32 %v2532_v18, %v3374_v34 }
0x1885   :  { %2536 = vrot.lane.b32.xlu0 %v2533_v43, %s3214_s27  ;;  %v2534_v20 = vmul.f32 %v2533_v43, %v2277_v61 }
0x18f7   :  { %v2537_v0 = vpop.permute.xlu0 %2536 }
0x18f8   :  { %v2539_v19 = vmul.f32 %v2537_v0, %v2533_v43 }
0x18fa   :  { %2541 = vrot.lane.b32.xlu1 %v2539_v19, %s3216_s28 }
0x196c   :  { %v2542_v21 = vpop.permute.xlu1 %2541 }
0x196d   :  { %v2544_v50 = vadd.f32 %v2542_v21, %v2534_v20 }
0x196f   :  { %3075 = vtanh.f32 %v2544_v50 }
0x197c   :  { %v3076_v22 = vpop.eup %3075 }
0x197d   :  { %2547 = vrot.lane.b32.xlu0 %v3076_v22, %s3217_s0 }
0x19ef   :  { %v2548_v26 = vpop.permute.xlu0 %2547 }
0x19f0   :  { %v2550_v34 = vmul.f32 %v2548_v26, %v2533_v43 }
0x19f2   :  { %2552 = vrot.lane.b32.xlu1 %v2550_v34, %s3218_s17 }
0x1a64   :  { %v2553_v24 = vpop.permute.xlu1 %2552 }
0x1a65   :  { %2555 = vst.msk [vmem:[#allocation3 + $0xe] sm:$0x3] %vm685_vm10, %v2553_v24 }
0x1a6c   :  { %v2557_v25 = vld [vmem:[#allocation3 + $0x8] sm:$0xff] }
0x1a6d   :  { %2992 = vmatmul.mubr.msk.f32.vlgmr.msra.gmra.mxu1 %vm219_vm5, %v2557_v25 }
0x1b2d   :  { %v2993_v29 = vpop.f32.mrf.mxu1 }
0x1b2e   :  { %v2644_v30 = vadd.f32 %v2993_v29, %v2786_v28 }
0x1b2f   :  { %v2638_v31 = vpop.f32.mrf.mxu1 }
0x1b30   :  { %v2639_v33 = vadd.f32 %v2786_v28, %v2638_v31  ;;  %v2648_v36 = vmax.f32 %v2644_v30, 0.0 }
0x1b32   :  { %v2647_v35 = vmax.f32 %v2639_v33, 0.0 }
0x1b34   :  { %2996 = vmatprep.mubr.msk.f32.mxu0 %vm132_vm2, %v2647_v35 }
0x1b35   :  { %2997 = vmatmul.mubr.msk.f32.vlgmr.msra.gmra.mxu0 %vm132_vm2, %v2648_v36 }
0x1bf5   :  { %v2998_v38 = vpop.f32.mrf.mxu0 }
0x1bf6   :  { %v2738_v39 = vadd.f32 %v2998_v38, %v2789_v37 }
0x1bf7   :  { %v2732_v40 = vpop.f32.mrf.mxu0 }
0x1bf8   :  { %2743 = vst.msk [vmem:[%s3658_s16 + $0x8] sm:$0xff] %vm2741_vm11, %v2738_v39  ;;  %v2733_v41 = vadd.f32 %v2789_v37, %v2732_v40 }
0x1bfa   :  { %2742 = vst.msk [vmem:[%s3658_s16] sm:$0xff] %vm2741_vm11, %v2733_v41 }
0x1bfb   :  { %2748 = vsyncpa [#allocation5], 1 }
0x1bfc   :  { %2749 = vsyncpa [#allocation7], 1 }
0x1bfd   :  { %2750 = vsyncpa [#allocation10], 1 }
0x1bfe   :  { %2751 = vsyncpa [#allocation13], 1 }

</bundles_post_ra>
